<compile_context>
chip_gen: v7x
topology: tpu7x:2x2x1
jax: 0.10.0
libtpu: 0.0.40
codegen_flags: <defaults>
</compile_context>

<pallas_src>
import functools

import jax
import jax.numpy as jnp
from jax.experimental import pallas as pl
from jax.experimental.pallas import tpu as pltpu

EPS = 1e-5        # BatchNorm2d default eps
SLOPE = 0.1       # LeakyReLU negative slope


# ---------------------------------------------------------------------------
# small helpers
# ---------------------------------------------------------------------------
def _cdiv(a, b):
    return -(-a // b)


def _round_up(v, m):
    return _cdiv(v, m) * m


def _vmem_capacity():
    try:
        info = pltpu.get_tpu_info()
        cap = int(getattr(info, "vmem_capacity_bytes", 0))
        if cap > 0:
            return cap
    except Exception:
        pass
    return 64 << 20  # conservative (v7x per-TC)


_VMEM_CAP = _vmem_capacity()
_VMEM_LIMIT_CAP = max(32 << 20, min(_VMEM_CAP - (16 << 20), (_VMEM_CAP * 3) // 4))
_FUSED_BUDGET = _VMEM_CAP // 4              # fused-BN eligibility threshold
TM_MAX = 4096 if _VMEM_CAP >= (100 << 20) else 2048   # lane-tile cap (mult of 128)


def _tile_plan(M):
    """Lane tile TM (multiple of 128), padded M, number of tiles.
    Ensures ntiles >= 2 when M >= 256 so v7x's two TensorCores both get work."""
    m128 = _round_up(max(M, 1), 128)
    ntiles = _cdiv(m128, TM_MAX)
    if m128 >= 256 and ntiles < 2:
        ntiles = 2
    tm = _round_up(_cdiv(m128, ntiles), 128)
    return tm, tm * ntiles, ntiles


def _fused_bytes(Kd, Co, Mpad):
    """Rough VMEM footprint of the fused BN kernel (operands + f32 temps)."""
    kd = _round_up(Kd, 16)
    co = _round_up(Co, 8)
    return kd * Mpad * 2 + 8 * co * Mpad * 4 + kd * co * 2 + (2 << 20)


def _call_kwargs(flops, bytes_accessed, vmem_bytes, semantics):
    vmem = int(min(max(vmem_bytes, 16 << 20), _VMEM_LIMIT_CAP))
    return dict(
        compiler_params=pltpu.CompilerParams(
            dimension_semantics=semantics,
            vmem_limit_bytes=vmem,
        ),
        cost_estimate=pl.CostEstimate(
            flops=max(int(flops), 1),
            transcendentals=0,
            bytes_accessed=max(int(bytes_accessed), 1),
        ),
    )


# ---------------------------------------------------------------------------
# Pallas kernels
# ---------------------------------------------------------------------------
def _fused_bn_kernel(w_ref, p_ref, g_ref, b_ref, o_ref, *, m_valid, slope):
    """Conv-GEMM + training-mode BatchNorm + LeakyReLU in one kernel.

    w: (Co, Kd) bf16   p: (Kd, Mpad) bf16   g,b: (Co, 1) f32
    o: (Co, Mpad) bf16.  Columns >= m_valid are zero-padding and are masked
    out of the batch statistics.  Conv bias is omitted (cancels under BN)."""
    y = jnp.dot(w_ref[...], p_ref[...], preferred_element_type=jnp.float32)
    co, mpad = y.shape
    lane = jax.lax.broadcasted_iota(jnp.int32, (co, mpad), 1)
    valid = lane < m_valid
    inv_m = 1.0 / float(m_valid)
    mean = jnp.sum(jnp.where(valid, y, 0.0), axis=1, keepdims=True) * inv_m
    d = jnp.where(valid, y - mean, 0.0)                  # centered (no cancellation)
    var = jnp.sum(d * d, axis=1, keepdims=True) * inv_m  # biased (training mode)
    scale = g_ref[...] * jax.lax.rsqrt(var + EPS)
    z = d * scale + b_ref[...]
    o_ref[...] = jnp.where(z >= 0.0, z, slope * z).astype(o_ref.dtype)


def _gemm_bias_act_kernel(w_ref, p_ref, b_ref, o_ref, *, slope):
    y = jnp.dot(w_ref[...], p_ref[...], preferred_element_type=jnp.float32)
    y = y + b_ref[...]                                    # (Co, 1) broadcast over lanes
    if slope is not None:
        y = jnp.where(y >= 0.0, y, slope * y)
    o_ref[...] = y.astype(o_ref.dtype)


# --- fallback (large-M) 2-pass BatchNorm pipeline ---------------------------
def _gemm_stats_kernel(w_ref, p_ref, y_ref, st_ref):
    # TODO(synk): per-tile shifted/Welford stats would avoid E[y^2]-E[y]^2
    # cancellation for extremely large M; acceptable at fallback sizes.
    y = jnp.dot(w_ref[...], p_ref[...], preferred_element_type=jnp.float32)
    y_ref[...] = y
    s = jnp.sum(y, axis=1, keepdims=True)
    sq = jnp.sum(y * y, axis=1, keepdims=True)
    st_ref[0] = jnp.concatenate([s, sq], axis=1)          # (Co, 2) packed partials


def _scale_shift_act_kernel(y_ref, sc_ref, sh_ref, o_ref, *, slope):
    z = y_ref[...] * sc_ref[...] + sh_ref[...]
    o_ref[...] = jnp.where(z >= 0.0, z, slope * z).astype(o_ref.dtype)


# ---------------------------------------------------------------------------
# pallas_call wrappers
# ---------------------------------------------------------------------------
def _fused_bn_call(wT, pT, gamma, beta, M, slope):
    Co, Kd = wT.shape
    Mpad = pT.shape[1]
    flops = 2 * Co * Kd * Mpad + 8 * Co * Mpad
    bytes_acc = wT.size * 2 + pT.size * 2 + Co * Mpad * 2 + 4 * Co * 4
    vmem = _fused_bytes(Kd, Co, Mpad) + (2 << 20)
    kern = functools.partial(_fused_bn_kernel, m_valid=M, slope=slope)
    return pl.pallas_call(
        kern,
        out_shape=jax.ShapeDtypeStruct((Co, Mpad), jnp.bfloat16),
        grid=(1,),
        in_specs=[
            pl.BlockSpec((Co, Kd), lambda i: (0, 0)),
            pl.BlockSpec((Kd, Mpad), lambda i: (0, 0)),
            pl.BlockSpec((Co, 1), lambda i: (0, 0)),
            pl.BlockSpec((Co, 1), lambda i: (0, 0)),
        ],
        out_specs=pl.BlockSpec((Co, Mpad), lambda i: (0, 0)),
        **_call_kwargs(flops, bytes_acc, vmem, ("arbitrary",)),
    )(wT, pT, gamma, beta)


def _gemm_bias_act_call(wT, pT, bias, TM, ntiles, slope, out_dtype):
    Co, Kd = wT.shape
    Mpad = pT.shape[1]
    osz = jnp.dtype(out_dtype).itemsize
    flops = 2 * Co * Kd * Mpad
    bytes_acc = (wT.size + pT.size) * 2 + Co * Mpad * osz + Co * 4
    vmem = (2 * (_round_up(Kd, 16) * TM * 2 + _round_up(Co, 8) * TM * osz)
            + 2 * _round_up(Co, 8) * TM * 4 + (4 << 20))
    kern = functools.partial(_gemm_bias_act_kernel, slope=slope)
    return pl.pallas_call(
        kern,
        out_shape=jax.ShapeDtypeStruct((Co, Mpad), out_dtype),
        grid=(ntiles,),
        in_specs=[
            pl.BlockSpec((Co, Kd), lambda i: (0, 0)),     # weights stay resident
            pl.BlockSpec((Kd, TM), lambda i: (0, i)),     # patch tile, pipelined
            pl.BlockSpec((Co, 1), lambda i: (0, 0)),
        ],
        out_specs=pl.BlockSpec((Co, TM), lambda i: (0, i)),
        **_call_kwargs(flops, bytes_acc, vmem, ("parallel",)),
    )(wT, pT, bias)


def _gemm_stats_call(wT, pT, TM, ntiles):
    Co, Kd = wT.shape
    Mpad = pT.shape[1]
    flops = 2 * Co * Kd * Mpad
    bytes_acc = (wT.size + pT.size) * 2 + Co * Mpad * 4 + ntiles * Co * 2 * 4
    vmem = 2 * (_round_up(Kd, 16) * TM * 2 + _round_up(Co, 8) * TM * 4) + (4 << 20)
    return pl.pallas_call(
        _gemm_stats_kernel,
        out_shape=(
            jax.ShapeDtypeStruct((Co, Mpad), jnp.float32),
            jax.ShapeDtypeStruct((ntiles, Co, 2), jnp.float32),
        ),
        grid=(ntiles,),
        in_specs=[
            pl.BlockSpec((Co, Kd), lambda i: (0, 0)),
            pl.BlockSpec((Kd, TM), lambda i: (0, i)),
        ],
        out_specs=(
            pl.BlockSpec((Co, TM), lambda i: (0, i)),
            pl.BlockSpec((1, Co, 2), lambda i: (i, 0, 0)),
        ),
        **_call_kwargs(flops, bytes_acc, vmem, ("parallel",)),
    )(wT, pT)


def _scale_shift_call(y, scale, shift, TM, ntiles, slope):
    Co, Mpad = y.shape
    bytes_acc = Co * Mpad * 4 + Co * Mpad * 2 + 2 * Co * 4
    vmem = 2 * _round_up(Co, 8) * TM * (4 + 2) + (2 << 20)
    kern = functools.partial(_scale_shift_act_kernel, slope=slope)
    return pl.pallas_call(
        kern,
        out_shape=jax.ShapeDtypeStruct((Co, Mpad), jnp.bfloat16),
        grid=(ntiles,),
        in_specs=[
            pl.BlockSpec((Co, TM), lambda i: (0, i)),
            pl.BlockSpec((Co, 1), lambda i: (0, 0)),
            pl.BlockSpec((Co, 1), lambda i: (0, 0)),
        ],
        out_specs=pl.BlockSpec((Co, TM), lambda i: (0, i)),
        **_call_kwargs(2 * Co * Mpad, bytes_acc, vmem, ("parallel",)),
    )(y, scale, shift)


# ---------------------------------------------------------------------------
# JAX glue: channel-major im2col, conv / deconv layers
# ---------------------------------------------------------------------------
def _patches_cm(x, K, stride, pad):
    """x: (C, N, H, W) -> patches (K*K*C rows ordered (c, kh, kw), N*Ho*Wo cols).
    Pure tap-concat (no transpose materialization)."""
    C, N, H, W = x.shape
    xp = jnp.pad(x, ((0, 0), (0, 0), (pad, pad), (pad, pad)))
    Ho = (H + 2 * pad - K) // stride + 1
    Wo = (W + 2 * pad - K) // stride + 1
    M = N * Ho * Wo
    taps = []
    for kh in range(K):
        for kw in range(K):
            taps.append(
                xp[:, :, kh:kh + stride * Ho:stride, kw:kw + stride * Wo:stride]
                .reshape(C, 1, M))
    p = jnp.concatenate(taps, axis=1)          # (C, K*K, M), order (kh, kw) on axis 1
    return p.reshape(C * K * K, M), Ho, Wo


def conv2d_cm(x, w, b, gamma, beta, *, stride, pad, use_bn, slope,
              out_dtype=jnp.bfloat16):
    """x: (Cin, N, H, W) bf16.  w: (Cout, Cin, K, K) f32 (PyTorch layout).
    Returns (Cout, N, Ho, Wo) in `out_dtype` (bf16 for BN layers)."""
    Cout, Cin, K, _ = w.shape
    _, N, H, W = x.shape

    pT, Ho, Wo = _patches_cm(x, K, stride, pad)          # (Kd, M) bf16
    Kd, M = pT.shape
    wT = w.reshape(Cout, Kd).astype(jnp.bfloat16)        # row order matches patches

    if use_bn:
        Mpad = _round_up(M, 128)
        if _fused_bytes(Kd, Cout, Mpad) <= _FUSED_BUDGET:
            # Fully fused: GEMM + batch stats + scale/shift + LeakyReLU, bf16 out.
            if Mpad != M:
                pT = jnp.pad(pT, ((0, 0), (0, Mpad - M)))
            y = _fused_bn_call(
                wT, pT,
                gamma.reshape(Cout, 1).astype(jnp.float32),
                beta.reshape(Cout, 1).astype(jnp.float32),
                M, slope)
        else:
            # Large-M fallback: tiled GEMM + packed per-tile stats, tiny JAX
            # combine, tiled scale/shift (bf16 out).
            TM, Mpad, ntiles = _tile_plan(M)
            if Mpad != M:
                pT = jnp.pad(pT, ((0, 0), (0, Mpad - M)))
            yf, st = _gemm_stats_call(wT, pT, TM, ntiles)
            tot = jnp.sum(st, axis=0)                    # (Cout, 2)
            inv_m = 1.0 / float(M)
            mean = tot[:, 0:1] * inv_m
            var = jnp.maximum(tot[:, 1:2] * inv_m - mean * mean, 0.0)
            scale = gamma.reshape(Cout, 1) * jax.lax.rsqrt(var + EPS)
            shift = beta.reshape(Cout, 1) - mean * scale
            y = _scale_shift_call(yf, scale, shift, TM, ntiles, slope)
    else:
        TM, Mpad, ntiles = _tile_plan(M)
        if Mpad != M:
            pT = jnp.pad(pT, ((0, 0), (0, Mpad - M)))
        y = _gemm_bias_act_call(wT, pT,
                                b.reshape(Cout, 1).astype(jnp.float32),
                                TM, ntiles, slope, out_dtype)

    y = y[:, :M]                                         # drop lane padding
    return y.reshape(Cout, N, Ho, Wo)


# Sub-pixel decomposition of ConvTranspose2d(kernel=4, stride=2, padding=1):
# output parity r (rows): out[2q+r] uses taps kh = {3,1} (r=0) / {2,0} (r=1)
# at input rows q-1,q / q,q+1 -> expressible via the 3x3 (pad=1) conv taps.
_K_MAP = {(0, 0): 3, (0, 1): 1, (1, 1): 2, (1, 2): 0}


def _deconv_subpixel_weight(w_t):
    """w_t: (Cin, Cout, 4, 4) -> equivalent stride-1 3x3 weight (4*Cout, Cin, 3, 3)
    whose output channels are ordered (r, s, co) over the 2x2 output parities."""
    Cin, Cout = w_t.shape[0], w_t.shape[1]
    zero = jnp.zeros((Cin, Cout), w_t.dtype)
    blocks = []
    for r in range(2):
        for s in range(2):
            rows = []
            for ty in range(3):
                cols = []
                for tx in range(3):
                    kh = _K_MAP.get((r, ty))
                    kw = _K_MAP.get((s, tx))
                    cols.append(zero if (kh is None or kw is None)
                                else w_t[:, :, kh, kw])
                rows.append(jnp.stack(cols, axis=-1))     # (Cin, Cout, 3)
            blocks.append(jnp.stack(rows, axis=-2))       # (Cin, Cout, 3, 3)
    w_eq = jnp.concatenate(blocks, axis=1)                # (Cin, 4*Cout, 3, 3)
    return jnp.transpose(w_eq, (1, 0, 2, 3))              # (4*Cout, Cin, 3, 3)


def conv_transpose2d_cm(x, w_t, b, *, slope):
    """ConvTranspose2d(k=4, s=2, p=1) + LeakyReLU via one 3x3 GEMM + depth-to-space.
    x: (Cin, N, H, W) bf16 -> (Cout, N, 2H, 2W) bf16."""
    Cin, N, H, W = x.shape
    Cout = w_t.shape[1]
    w_eq = _deconv_subpixel_weight(w_t)
    b_eq = jnp.tile(b, 4)                                 # channel order (r, s, co)
    y = conv2d_cm(x, w_eq, b_eq, None, None, stride=1, pad=1,
                  use_bn=False, slope=slope)              # (4*Cout, N, H, W)
    y = y.reshape(2, 2, Cout, N, H, W)
    y = jnp.transpose(y, (2, 3, 4, 0, 5, 1)).reshape(Cout, N, 2 * H, 2 * W)
    return y


# ---------------------------------------------------------------------------
# Parameters (deterministic synthetic init, PyTorch shapes)
# ---------------------------------------------------------------------------
def init_params(key, C):
    def convp(k, cin, cout, K):
        k1, k2 = jax.random.split(k)
        w = jax.random.normal(k1, (cout, cin, K, K), jnp.float32) * 0.1
        b = jax.random.normal(k2, (cout,), jnp.float32) * 0.1
        return [w, b]

    def deconvp(k, cin, cout, K):
        k1, k2 = jax.random.split(k)
        w = jax.random.normal(k1, (cin, cout, K, K), jnp.float32) * 0.1
        b = jax.random.normal(k2, (cout,), jnp.float32) * 0.1
        return [w, b]

    ks = jax.random.split(key, 9)
    params = {
        'conv1':   convp(ks[0], C, C, 4),
        'conv2':   convp(ks[1], C, C, 4),
        'conv2_1': convp(ks[2], C, C, 3),
        'conv3':   convp(ks[3], C, C, 4),
        'conv3_1': convp(ks[4], C, C, 3),
        'deconv2': deconvp(ks[5], C, C, 4),
        'deconv1': deconvp(ks[6], 2 * C, C, 4),
        'deconv0': deconvp(ks[7], 2 * C, C, 4),
        'output':  convp(ks[8], 2 * C, C, 3),
    }
    # BatchNorm2d affine params (PyTorch default init: gamma=1, beta=0)
    for name in ['conv1', 'conv2', 'conv2_1', 'conv3', 'conv3_1']:
        params[name] += [jnp.ones((C,), jnp.float32), jnp.zeros((C,), jnp.float32)]
    return params


# ---------------------------------------------------------------------------
# UNet forward (mirrors the PyTorch module; training-mode BatchNorm)
# ---------------------------------------------------------------------------
@jax.jit
def unet_forward(x_nchw, params):
    # Channel-major (C, N, H, W) bf16 activations end-to-end.
    x = jnp.transpose(x_nchw, (1, 0, 2, 3)).astype(jnp.bfloat16)

    def cbn(h, p, stride, pad):
        w, b, g, bt = p
        return conv2d_cm(h, w, b, g, bt, stride=stride, pad=pad,
                         use_bn=True, slope=SLOPE)

    conv1 = cbn(x, params['conv1'], 2, 1)
    conv2 = cbn(cbn(conv1, params['conv2'], 2, 1), params['conv2_1'], 1, 1)
    conv3 = cbn(cbn(conv2, params['conv3'], 2, 1), params['conv3_1'], 1, 1)

    deconv2 = conv_transpose2d_cm(conv3, *params['deconv2'], slope=SLOPE)
    concat2 = jnp.concatenate([conv2, deconv2], axis=0)    # torch.cat dim=1
    deconv1 = conv_transpose2d_cm(concat2, *params['deconv1'], slope=SLOPE)
    concat1 = jnp.concatenate([conv1, deconv1], axis=0)
    deconv0 = conv_transpose2d_cm(concat1, *params['deconv0'], slope=SLOPE)
    concat0 = jnp.concatenate([x, deconv0], axis=0)

    w, b = params['output']
    out = conv2d_cm(concat0, w, b, None, None, stride=1, pad=1,
                    use_bn=False, slope=None, out_dtype=jnp.float32)  # no activation
    return jnp.transpose(out, (1, 0, 2, 3))                 # back to NCHW


if __name__ == "__main__":
    B, C, H, W = 2, 4, 16, 16
    key = jax.random.PRNGKey(0)
    kx, kp = jax.random.split(key)
    x = jax.random.normal(kx, (B, C, H, W), jnp.float32)
    params = init_params(kp, C)

    y = unet_forward(x, params)
    jax.block_until_ready(y)
    assert y.shape == (B, C, H, W), y.shape
    print("KERNEL_OK")
</pallas_src>

<mosaic_0001>
module attributes {stable_mosaic.version = 11 : i64} {
  func.func @_fused_bn_kernel(%arg0: i32, %arg1: memref<4x64xbf16, #tpu.memory_space<vmem>>, %arg2: memref<64x128xbf16, #tpu.memory_space<vmem>>, %arg3: memref<4x1xf32, #tpu.memory_space<vmem>>, %arg4: memref<4x1xf32, #tpu.memory_space<vmem>>, %arg5: memref<4x128xbf16, #tpu.memory_space<vmem>>) attributes {dimension_semantics = [#tpu.dimension_semantics<arbitrary>], iteration_bounds = array<i64: 1>, scalar_prefetch = 0 : i64, scratch_operands = 0 : i64, tpu.core_type = #tpu.core_type<tc>, window_params = [{pipeline_mode = #tpu.pipeline_mode<synchronous>, transform_indices = @transform_0, window_bounds = array<i64: 4, 64>}, {pipeline_mode = #tpu.pipeline_mode<synchronous>, transform_indices = @transform_1, window_bounds = array<i64: 64, 128>}, {pipeline_mode = #tpu.pipeline_mode<synchronous>, transform_indices = @transform_2, window_bounds = array<i64: 4, 1>}, {pipeline_mode = #tpu.pipeline_mode<synchronous>, transform_indices = @transform_3, window_bounds = array<i64: 4, 1>}, {pipeline_mode = #tpu.pipeline_mode<synchronous>, transform_indices = @transform_4, window_bounds = array<i64: 4, 128>}]} {
    %c0 = arith.constant 0 : index
    %c0_0 = arith.constant 0 : index
    %0 = vector.load %arg1[%c0, %c0_0] : memref<4x64xbf16, #tpu.memory_space<vmem>>, vector<4x64xbf16>
    %c0_1 = arith.constant 0 : index
    %c0_2 = arith.constant 0 : index
    %1 = vector.load %arg2[%c0_1, %c0_2] : memref<64x128xbf16, #tpu.memory_space<vmem>>, vector<64x128xbf16>
    %cst = arith.constant dense<0.000000e+00> : vector<4x128xf32>
    %2 = tpu.matmul %0, %1, %cst {dimension_numbers = #tpu.dot_dimension_numbers<[1], [0], [0], [1], [0, 0, 1, 1], [], []>} : vector<4x64xbf16>, vector<64x128xbf16>, vector<4x128xf32> -> vector<4x128xf32>
    %3 = tpu.iota {dimensions = array<i32: 1>} : vector<4x128xi32>
    %c128_i32 = arith.constant 128 : i32
    %4 = vector.broadcast %c128_i32 : i32 to vector<4x128xi32>
    %5 = arith.cmpi slt, %3, %4 : vector<4x128xi32>
    %cst_3 = arith.constant 0.000000e+00 : f32
    %6 = vector.broadcast %cst_3 : f32 to vector<4x128xf32>
    %7 = arith.select %5, %2, %6 : vector<4x128xi1>, vector<4x128xf32>
    %cst_4 = arith.constant dense<0.000000e+00> : vector<4xf32>
    %8 = vector.multi_reduction <add>, %7, %cst_4 [1] : vector<4x128xf32> to vector<4xf32>
    %9 = vector.shape_cast %8 : vector<4xf32> to vector<4x1xf32>
    %cst_5 = arith.constant 7.812500e-03 : f32
    %10 = vector.broadcast %cst_5 : f32 to vector<4x1xf32>
    %11 = arith.mulf %9, %10 : vector<4x1xf32>
    %12 = vector.broadcast %11 : vector<4x1xf32> to vector<4x128xf32>
    %13 = arith.subf %2, %12 : vector<4x128xf32>
    %cst_6 = arith.constant 0.000000e+00 : f32
    %14 = vector.broadcast %cst_6 : f32 to vector<4x128xf32>
    %15 = arith.select %5, %13, %14 : vector<4x128xi1>, vector<4x128xf32>
    %16 = arith.mulf %15, %15 : vector<4x128xf32>
    %cst_7 = arith.constant dense<0.000000e+00> : vector<4xf32>
    %17 = vector.multi_reduction <add>, %16, %cst_7 [1] : vector<4x128xf32> to vector<4xf32>
    %18 = vector.shape_cast %17 : vector<4xf32> to vector<4x1xf32>
    %cst_8 = arith.constant 7.812500e-03 : f32
    %19 = vector.broadcast %cst_8 : f32 to vector<4x1xf32>
    %20 = arith.mulf %18, %19 : vector<4x1xf32>
    %c0_9 = arith.constant 0 : index
    %c0_10 = arith.constant 0 : index
    %21 = vector.load %arg3[%c0_9, %c0_10] : memref<4x1xf32, #tpu.memory_space<vmem>>, vector<4x1xf32>
    %cst_11 = arith.constant 9.99999974E-6 : f32
    %22 = vector.broadcast %cst_11 : f32 to vector<4x1xf32>
    %23 = arith.addf %20, %22 : vector<4x1xf32>
    %24 = math.rsqrt %23 : vector<4x1xf32>
    %25 = arith.mulf %21, %24 : vector<4x1xf32>
    %26 = vector.broadcast %25 : vector<4x1xf32> to vector<4x128xf32>
    %27 = arith.mulf %15, %26 : vector<4x128xf32>
    %c0_12 = arith.constant 0 : index
    %c0_13 = arith.constant 0 : index
    %28 = vector.load %arg4[%c0_12, %c0_13] : memref<4x1xf32, #tpu.memory_space<vmem>>, vector<4x1xf32>
    %29 = vector.broadcast %28 : vector<4x1xf32> to vector<4x128xf32>
    %30 = arith.addf %27, %29 : vector<4x128xf32>
    %cst_14 = arith.constant 0.000000e+00 : f32
    %31 = vector.broadcast %cst_14 : f32 to vector<4x128xf32>
    %32 = arith.cmpf oge, %30, %31 : vector<4x128xf32>
    %cst_15 = arith.constant 1.000000e-01 : f32
    %33 = vector.broadcast %cst_15 : f32 to vector<4x128xf32>
    %34 = arith.mulf %33, %30 : vector<4x128xf32>
    %35 = arith.select %32, %30, %34 : vector<4x128xi1>, vector<4x128xf32>
    %36 = arith.truncf %35 : vector<4x128xf32> to vector<4x128xbf16>
    %c0_16 = arith.constant 0 : index
    %c0_17 = arith.constant 0 : index
    %37 = vector.load %arg5[%c0_16, %c0_17] : memref<4x128xbf16, #tpu.memory_space<vmem>>, vector<4x128xbf16>
    tpu.vector_store %arg5[%c0_16, %c0_17], %36 {strides = array<i32>} : memref<4x128xbf16, #tpu.memory_space<vmem>>, vector<4x128xbf16>,
    return
  }
  func.func @transform_0(%arg0: i32) -> (i32, i32) {
    %c0_i32 = arith.constant 0 : i32
    %c0_i32_0 = arith.constant 0 : i32
    %c0_i32_1 = arith.constant 0 : i32
    return %c0_i32, %c0_i32_0 : i32, i32
  }
  func.func @transform_1(%arg0: i32) -> (i32, i32) {
    %c0_i32 = arith.constant 0 : i32
    %c0_i32_0 = arith.constant 0 : i32
    %c0_i32_1 = arith.constant 0 : i32
    return %c0_i32, %c0_i32_0 : i32, i32
  }
  func.func @transform_2(%arg0: i32) -> (i32, i32) {
    %c0_i32 = arith.constant 0 : i32
    %c0_i32_0 = arith.constant 0 : i32
    %c0_i32_1 = arith.constant 0 : i32
    return %c0_i32, %c0_i32_0 : i32, i32
  }
  func.func @transform_3(%arg0: i32) -> (i32, i32) {
    %c0_i32 = arith.constant 0 : i32
    %c0_i32_0 = arith.constant 0 : i32
    %c0_i32_1 = arith.constant 0 : i32
    return %c0_i32, %c0_i32_0 : i32, i32
  }
  func.func @transform_4(%arg0: i32) -> (i32, i32) {
    %c0_i32 = arith.constant 0 : i32
    %c0_i32_0 = arith.constant 0 : i32
    %c0_i32_1 = arith.constant 0 : i32
    return %c0_i32, %c0_i32_0 : i32, i32
  }
}

module attributes {stable_mosaic.version = 11 : i64} {
  func.func @_fused_bn_kernel(%arg0: i32, %arg1: memref<4x64xbf16, #tpu.memory_space<vmem>>, %arg2: memref<64x128xbf16, #tpu.memory_space<vmem>>, %arg3: memref<4x1xf32, #tpu.memory_space<vmem>>, %arg4: memref<4x1xf32, #tpu.memory_space<vmem>>, %arg5: memref<4x128xbf16, #tpu.memory_space<vmem>>) attributes {dimension_semantics = [#tpu.dimension_semantics<arbitrary>], iteration_bounds = array<i64: 1>, scalar_prefetch = 0 : i64, scratch_operands = 0 : i64, tpu.core_type = #tpu.core_type<tc>, window_params = [{pipeline_mode = #tpu.pipeline_mode<synchronous>, transform_indices = @transform_0, window_bounds = array<i64: 4, 64>}, {pipeline_mode = #tpu.pipeline_mode<synchronous>, transform_indices = @transform_1, window_bounds = array<i64: 64, 128>}, {pipeline_mode = #tpu.pipeline_mode<synchronous>, transform_indices = @transform_2, window_bounds = array<i64: 4, 1>}, {pipeline_mode = #tpu.pipeline_mode<synchronous>, transform_indices = @transform_3, window_bounds = array<i64: 4, 1>}, {pipeline_mode = #tpu.pipeline_mode<synchronous>, transform_indices = @transform_4, window_bounds = array<i64: 4, 128>}]} {
    %c0 = arith.constant 0 : index
    %c0_0 = arith.constant 0 : index
    %0 = vector.load %arg1[%c0, %c0_0] : memref<4x64xbf16, #tpu.memory_space<vmem>>, vector<4x64xbf16>
    %c0_1 = arith.constant 0 : index
    %c0_2 = arith.constant 0 : index
    %1 = vector.load %arg2[%c0_1, %c0_2] : memref<64x128xbf16, #tpu.memory_space<vmem>>, vector<64x128xbf16>
    %cst = arith.constant dense<0.000000e+00> : vector<4x128xf32>
    %2 = tpu.matmul %0, %1, %cst {dimension_numbers = #tpu.dot_dimension_numbers<[1], [0], [0], [1], [0, 0, 1, 1], [], []>} : vector<4x64xbf16>, vector<64x128xbf16>, vector<4x128xf32> -> vector<4x128xf32>
    %3 = tpu.iota {dimensions = array<i32: 1>} : vector<4x128xi32>
    %c32_i32 = arith.constant 32 : i32
    %4 = vector.broadcast %c32_i32 : i32 to vector<4x128xi32>
    %5 = arith.cmpi slt, %3, %4 : vector<4x128xi32>
    %cst_3 = arith.constant 0.000000e+00 : f32
    %6 = vector.broadcast %cst_3 : f32 to vector<4x128xf32>
    %7 = arith.select %5, %2, %6 : vector<4x128xi1>, vector<4x128xf32>
    %cst_4 = arith.constant dense<0.000000e+00> : vector<4xf32>
    %8 = vector.multi_reduction <add>, %7, %cst_4 [1] : vector<4x128xf32> to vector<4xf32>
    %9 = vector.shape_cast %8 : vector<4xf32> to vector<4x1xf32>
    %cst_5 = arith.constant 3.125000e-02 : f32
    %10 = vector.broadcast %cst_5 : f32 to vector<4x1xf32>
    %11 = arith.mulf %9, %10 : vector<4x1xf32>
    %12 = vector.broadcast %11 : vector<4x1xf32> to vector<4x128xf32>
    %13 = arith.subf %2, %12 : vector<4x128xf32>
    %cst_6 = arith.constant 0.000000e+00 : f32
    %14 = vector.broadcast %cst_6 : f32 to vector<4x128xf32>
    %15 = arith.select %5, %13, %14 : vector<4x128xi1>, vector<4x128xf32>
    %16 = arith.mulf %15, %15 : vector<4x128xf32>
    %cst_7 = arith.constant dense<0.000000e+00> : vector<4xf32>
    %17 = vector.multi_reduction <add>, %16, %cst_7 [1] : vector<4x128xf32> to vector<4xf32>
    %18 = vector.shape_cast %17 : vector<4xf32> to vector<4x1xf32>
    %cst_8 = arith.constant 3.125000e-02 : f32
    %19 = vector.broadcast %cst_8 : f32 to vector<4x1xf32>
    %20 = arith.mulf %18, %19 : vector<4x1xf32>
    %c0_9 = arith.constant 0 : index
    %c0_10 = arith.constant 0 : index
    %21 = vector.load %arg3[%c0_9, %c0_10] : memref<4x1xf32, #tpu.memory_space<vmem>>, vector<4x1xf32>
    %cst_11 = arith.constant 9.99999974E-6 : f32
    %22 = vector.broadcast %cst_11 : f32 to vector<4x1xf32>
    %23 = arith.addf %20, %22 : vector<4x1xf32>
    %24 = math.rsqrt %23 : vector<4x1xf32>
    %25 = arith.mulf %21, %24 : vector<4x1xf32>
    %26 = vector.broadcast %25 : vector<4x1xf32> to vector<4x128xf32>
    %27 = arith.mulf %15, %26 : vector<4x128xf32>
    %c0_12 = arith.constant 0 : index
    %c0_13 = arith.constant 0 : index
    %28 = vector.load %arg4[%c0_12, %c0_13] : memref<4x1xf32, #tpu.memory_space<vmem>>, vector<4x1xf32>
    %29 = vector.broadcast %28 : vector<4x1xf32> to vector<4x128xf32>
    %30 = arith.addf %27, %29 : vector<4x128xf32>
    %cst_14 = arith.constant 0.000000e+00 : f32
    %31 = vector.broadcast %cst_14 : f32 to vector<4x128xf32>
    %32 = arith.cmpf oge, %30, %31 : vector<4x128xf32>
    %cst_15 = arith.constant 1.000000e-01 : f32
    %33 = vector.broadcast %cst_15 : f32 to vector<4x128xf32>
    %34 = arith.mulf %33, %30 : vector<4x128xf32>
    %35 = arith.select %32, %30, %34 : vector<4x128xi1>, vector<4x128xf32>
    %36 = arith.truncf %35 : vector<4x128xf32> to vector<4x128xbf16>
    %c0_16 = arith.constant 0 : index
    %c0_17 = arith.constant 0 : index
    %37 = vector.load %arg5[%c0_16, %c0_17] : memref<4x128xbf16, #tpu.memory_space<vmem>>, vector<4x128xbf16>
    tpu.vector_store %arg5[%c0_16, %c0_17], %36 {strides = array<i32>} : memref<4x128xbf16, #tpu.memory_space<vmem>>, vector<4x128xbf16>,
    return
  }
  func.func @transform_0(%arg0: i32) -> (i32, i32) {
    %c0_i32 = arith.constant 0 : i32
    %c0_i32_0 = arith.constant 0 : i32
    %c0_i32_1 = arith.constant 0 : i32
    return %c0_i32, %c0_i32_0 : i32, i32
  }
  func.func @transform_1(%arg0: i32) -> (i32, i32) {
    %c0_i32 = arith.constant 0 : i32
    %c0_i32_0 = arith.constant 0 : i32
    %c0_i32_1 = arith.constant 0 : i32
    return %c0_i32, %c0_i32_0 : i32, i32
  }
  func.func @transform_2(%arg0: i32) -> (i32, i32) {
    %c0_i32 = arith.constant 0 : i32
    %c0_i32_0 = arith.constant 0 : i32
    %c0_i32_1 = arith.constant 0 : i32
    return %c0_i32, %c0_i32_0 : i32, i32
  }
  func.func @transform_3(%arg0: i32) -> (i32, i32) {
    %c0_i32 = arith.constant 0 : i32
    %c0_i32_0 = arith.constant 0 : i32
    %c0_i32_1 = arith.constant 0 : i32
    return %c0_i32, %c0_i32_0 : i32, i32
  }
  func.func @transform_4(%arg0: i32) -> (i32, i32) {
    %c0_i32 = arith.constant 0 : i32
    %c0_i32_0 = arith.constant 0 : i32
    %c0_i32_1 = arith.constant 0 : i32
    return %c0_i32, %c0_i32_0 : i32, i32
  }
}

module attributes {stable_mosaic.version = 11 : i64} {
  func.func @_fused_bn_kernel(%arg0: i32, %arg1: memref<4x36xbf16, #tpu.memory_space<vmem>>, %arg2: memref<36x128xbf16, #tpu.memory_space<vmem>>, %arg3: memref<4x1xf32, #tpu.memory_space<vmem>>, %arg4: memref<4x1xf32, #tpu.memory_space<vmem>>, %arg5: memref<4x128xbf16, #tpu.memory_space<vmem>>) attributes {dimension_semantics = [#tpu.dimension_semantics<arbitrary>], iteration_bounds = array<i64: 1>, scalar_prefetch = 0 : i64, scratch_operands = 0 : i64, tpu.core_type = #tpu.core_type<tc>, window_params = [{pipeline_mode = #tpu.pipeline_mode<synchronous>, transform_indices = @transform_0, window_bounds = array<i64: 4, 36>}, {pipeline_mode = #tpu.pipeline_mode<synchronous>, transform_indices = @transform_1, window_bounds = array<i64: 36, 128>}, {pipeline_mode = #tpu.pipeline_mode<synchronous>, transform_indices = @transform_2, window_bounds = array<i64: 4, 1>}, {pipeline_mode = #tpu.pipeline_mode<synchronous>, transform_indices = @transform_3, window_bounds = array<i64: 4, 1>}, {pipeline_mode = #tpu.pipeline_mode<synchronous>, transform_indices = @transform_4, window_bounds = array<i64: 4, 128>}]} {
    %c0 = arith.constant 0 : index
    %c0_0 = arith.constant 0 : index
    %0 = vector.load %arg1[%c0, %c0_0] : memref<4x36xbf16, #tpu.memory_space<vmem>>, vector<4x36xbf16>
    %c0_1 = arith.constant 0 : index
    %c0_2 = arith.constant 0 : index
    %1 = vector.load %arg2[%c0_1, %c0_2] : memref<36x128xbf16, #tpu.memory_space<vmem>>, vector<36x128xbf16>
    %cst = arith.constant dense<0.000000e+00> : vector<4x128xf32>
    %2 = tpu.matmul %0, %1, %cst {dimension_numbers = #tpu.dot_dimension_numbers<[1], [0], [0], [1], [0, 0, 1, 1], [], []>} : vector<4x36xbf16>, vector<36x128xbf16>, vector<4x128xf32> -> vector<4x128xf32>
    %3 = tpu.iota {dimensions = array<i32: 1>} : vector<4x128xi32>
    %c32_i32 = arith.constant 32 : i32
    %4 = vector.broadcast %c32_i32 : i32 to vector<4x128xi32>
    %5 = arith.cmpi slt, %3, %4 : vector<4x128xi32>
    %cst_3 = arith.constant 0.000000e+00 : f32
    %6 = vector.broadcast %cst_3 : f32 to vector<4x128xf32>
    %7 = arith.select %5, %2, %6 : vector<4x128xi1>, vector<4x128xf32>
    %cst_4 = arith.constant dense<0.000000e+00> : vector<4xf32>
    %8 = vector.multi_reduction <add>, %7, %cst_4 [1] : vector<4x128xf32> to vector<4xf32>
    %9 = vector.shape_cast %8 : vector<4xf32> to vector<4x1xf32>
    %cst_5 = arith.constant 3.125000e-02 : f32
    %10 = vector.broadcast %cst_5 : f32 to vector<4x1xf32>
    %11 = arith.mulf %9, %10 : vector<4x1xf32>
    %12 = vector.broadcast %11 : vector<4x1xf32> to vector<4x128xf32>
    %13 = arith.subf %2, %12 : vector<4x128xf32>
    %cst_6 = arith.constant 0.000000e+00 : f32
    %14 = vector.broadcast %cst_6 : f32 to vector<4x128xf32>
    %15 = arith.select %5, %13, %14 : vector<4x128xi1>, vector<4x128xf32>
    %16 = arith.mulf %15, %15 : vector<4x128xf32>
    %cst_7 = arith.constant dense<0.000000e+00> : vector<4xf32>
    %17 = vector.multi_reduction <add>, %16, %cst_7 [1] : vector<4x128xf32> to vector<4xf32>
    %18 = vector.shape_cast %17 : vector<4xf32> to vector<4x1xf32>
    %cst_8 = arith.constant 3.125000e-02 : f32
    %19 = vector.broadcast %cst_8 : f32 to vector<4x1xf32>
    %20 = arith.mulf %18, %19 : vector<4x1xf32>
    %c0_9 = arith.constant 0 : index
    %c0_10 = arith.constant 0 : index
    %21 = vector.load %arg3[%c0_9, %c0_10] : memref<4x1xf32, #tpu.memory_space<vmem>>, vector<4x1xf32>
    %cst_11 = arith.constant 9.99999974E-6 : f32
    %22 = vector.broadcast %cst_11 : f32 to vector<4x1xf32>
    %23 = arith.addf %20, %22 : vector<4x1xf32>
    %24 = math.rsqrt %23 : vector<4x1xf32>
    %25 = arith.mulf %21, %24 : vector<4x1xf32>
    %26 = vector.broadcast %25 : vector<4x1xf32> to vector<4x128xf32>
    %27 = arith.mulf %15, %26 : vector<4x128xf32>
    %c0_12 = arith.constant 0 : index
    %c0_13 = arith.constant 0 : index
    %28 = vector.load %arg4[%c0_12, %c0_13] : memref<4x1xf32, #tpu.memory_space<vmem>>, vector<4x1xf32>
    %29 = vector.broadcast %28 : vector<4x1xf32> to vector<4x128xf32>
    %30 = arith.addf %27, %29 : vector<4x128xf32>
    %cst_14 = arith.constant 0.000000e+00 : f32
    %31 = vector.broadcast %cst_14 : f32 to vector<4x128xf32>
    %32 = arith.cmpf oge, %30, %31 : vector<4x128xf32>
    %cst_15 = arith.constant 1.000000e-01 : f32
    %33 = vector.broadcast %cst_15 : f32 to vector<4x128xf32>
    %34 = arith.mulf %33, %30 : vector<4x128xf32>
    %35 = arith.select %32, %30, %34 : vector<4x128xi1>, vector<4x128xf32>
    %36 = arith.truncf %35 : vector<4x128xf32> to vector<4x128xbf16>
    %c0_16 = arith.constant 0 : index
    %c0_17 = arith.constant 0 : index
    %37 = vector.load %arg5[%c0_16, %c0_17] : memref<4x128xbf16, #tpu.memory_space<vmem>>, vector<4x128xbf16>
    tpu.vector_store %arg5[%c0_16, %c0_17], %36 {strides = array<i32>} : memref<4x128xbf16, #tpu.memory_space<vmem>>, vector<4x128xbf16>,
    return
  }
  func.func @transform_0(%arg0: i32) -> (i32, i32) {
    %c0_i32 = arith.constant 0 : i32
    %c0_i32_0 = arith.constant 0 : i32
    %c0_i32_1 = arith.constant 0 : i32
    return %c0_i32, %c0_i32_0 : i32, i32
  }
  func.func @transform_1(%arg0: i32) -> (i32, i32) {
    %c0_i32 = arith.constant 0 : i32
    %c0_i32_0 = arith.constant 0 : i32
    %c0_i32_1 = arith.constant 0 : i32
    return %c0_i32, %c0_i32_0 : i32, i32
  }
  func.func @transform_2(%arg0: i32) -> (i32, i32) {
    %c0_i32 = arith.constant 0 : i32
    %c0_i32_0 = arith.constant 0 : i32
    %c0_i32_1 = arith.constant 0 : i32
    return %c0_i32, %c0_i32_0 : i32, i32
  }
  func.func @transform_3(%arg0: i32) -> (i32, i32) {
    %c0_i32 = arith.constant 0 : i32
    %c0_i32_0 = arith.constant 0 : i32
    %c0_i32_1 = arith.constant 0 : i32
    return %c0_i32, %c0_i32_0 : i32, i32
  }
  func.func @transform_4(%arg0: i32) -> (i32, i32) {
    %c0_i32 = arith.constant 0 : i32
    %c0_i32_0 = arith.constant 0 : i32
    %c0_i32_1 = arith.constant 0 : i32
    return %c0_i32, %c0_i32_0 : i32, i32
  }
}

module attributes {stable_mosaic.version = 11 : i64} {
  func.func @_fused_bn_kernel(%arg0: i32, %arg1: memref<4x64xbf16, #tpu.memory_space<vmem>>, %arg2: memref<64x128xbf16, #tpu.memory_space<vmem>>, %arg3: memref<4x1xf32, #tpu.memory_space<vmem>>, %arg4: memref<4x1xf32, #tpu.memory_space<vmem>>, %arg5: memref<4x128xbf16, #tpu.memory_space<vmem>>) attributes {dimension_semantics = [#tpu.dimension_semantics<arbitrary>], iteration_bounds = array<i64: 1>, scalar_prefetch = 0 : i64, scratch_operands = 0 : i64, tpu.core_type = #tpu.core_type<tc>, window_params = [{pipeline_mode = #tpu.pipeline_mode<synchronous>, transform_indices = @transform_0, window_bounds = array<i64: 4, 64>}, {pipeline_mode = #tpu.pipeline_mode<synchronous>, transform_indices = @transform_1, window_bounds = array<i64: 64, 128>}, {pipeline_mode = #tpu.pipeline_mode<synchronous>, transform_indices = @transform_2, window_bounds = array<i64: 4, 1>}, {pipeline_mode = #tpu.pipeline_mode<synchronous>, transform_indices = @transform_3, window_bounds = array<i64: 4, 1>}, {pipeline_mode = #tpu.pipeline_mode<synchronous>, transform_indices = @transform_4, window_bounds = array<i64: 4, 128>}]} {
    %c0 = arith.constant 0 : index
    %c0_0 = arith.constant 0 : index
    %0 = vector.load %arg1[%c0, %c0_0] : memref<4x64xbf16, #tpu.memory_space<vmem>>, vector<4x64xbf16>
    %c0_1 = arith.constant 0 : index
    %c0_2 = arith.constant 0 : index
    %1 = vector.load %arg2[%c0_1, %c0_2] : memref<64x128xbf16, #tpu.memory_space<vmem>>, vector<64x128xbf16>
    %cst = arith.constant dense<0.000000e+00> : vector<4x128xf32>
    %2 = tpu.matmul %0, %1, %cst {dimension_numbers = #tpu.dot_dimension_numbers<[1], [0], [0], [1], [0, 0, 1, 1], [], []>} : vector<4x64xbf16>, vector<64x128xbf16>, vector<4x128xf32> -> vector<4x128xf32>
    %3 = tpu.iota {dimensions = array<i32: 1>} : vector<4x128xi32>
    %c8_i32 = arith.constant 8 : i32
    %4 = vector.broadcast %c8_i32 : i32 to vector<4x128xi32>
    %5 = arith.cmpi slt, %3, %4 : vector<4x128xi32>
    %cst_3 = arith.constant 0.000000e+00 : f32
    %6 = vector.broadcast %cst_3 : f32 to vector<4x128xf32>
    %7 = arith.select %5, %2, %6 : vector<4x128xi1>, vector<4x128xf32>
    %cst_4 = arith.constant dense<0.000000e+00> : vector<4xf32>
    %8 = vector.multi_reduction <add>, %7, %cst_4 [1] : vector<4x128xf32> to vector<4xf32>
    %9 = vector.shape_cast %8 : vector<4xf32> to vector<4x1xf32>
    %cst_5 = arith.constant 1.250000e-01 : f32
    %10 = vector.broadcast %cst_5 : f32 to vector<4x1xf32>
    %11 = arith.mulf %9, %10 : vector<4x1xf32>
    %12 = vector.broadcast %11 : vector<4x1xf32> to vector<4x128xf32>
    %13 = arith.subf %2, %12 : vector<4x128xf32>
    %cst_6 = arith.constant 0.000000e+00 : f32
    %14 = vector.broadcast %cst_6 : f32 to vector<4x128xf32>
    %15 = arith.select %5, %13, %14 : vector<4x128xi1>, vector<4x128xf32>
    %16 = arith.mulf %15, %15 : vector<4x128xf32>
    %cst_7 = arith.constant dense<0.000000e+00> : vector<4xf32>
    %17 = vector.multi_reduction <add>, %16, %cst_7 [1] : vector<4x128xf32> to vector<4xf32>
    %18 = vector.shape_cast %17 : vector<4xf32> to vector<4x1xf32>
    %cst_8 = arith.constant 1.250000e-01 : f32
    %19 = vector.broadcast %cst_8 : f32 to vector<4x1xf32>
    %20 = arith.mulf %18, %19 : vector<4x1xf32>
    %c0_9 = arith.constant 0 : index
    %c0_10 = arith.constant 0 : index
    %21 = vector.load %arg3[%c0_9, %c0_10] : memref<4x1xf32, #tpu.memory_space<vmem>>, vector<4x1xf32>
    %cst_11 = arith.constant 9.99999974E-6 : f32
    %22 = vector.broadcast %cst_11 : f32 to vector<4x1xf32>
    %23 = arith.addf %20, %22 : vector<4x1xf32>
    %24 = math.rsqrt %23 : vector<4x1xf32>
    %25 = arith.mulf %21, %24 : vector<4x1xf32>
    %26 = vector.broadcast %25 : vector<4x1xf32> to vector<4x128xf32>
    %27 = arith.mulf %15, %26 : vector<4x128xf32>
    %c0_12 = arith.constant 0 : index
    %c0_13 = arith.constant 0 : index
    %28 = vector.load %arg4[%c0_12, %c0_13] : memref<4x1xf32, #tpu.memory_space<vmem>>, vector<4x1xf32>
    %29 = vector.broadcast %28 : vector<4x1xf32> to vector<4x128xf32>
    %30 = arith.addf %27, %29 : vector<4x128xf32>
    %cst_14 = arith.constant 0.000000e+00 : f32
    %31 = vector.broadcast %cst_14 : f32 to vector<4x128xf32>
    %32 = arith.cmpf oge, %30, %31 : vector<4x128xf32>
    %cst_15 = arith.constant 1.000000e-01 : f32
    %33 = vector.broadcast %cst_15 : f32 to vector<4x128xf32>
    %34 = arith.mulf %33, %30 : vector<4x128xf32>
    %35 = arith.select %32, %30, %34 : vector<4x128xi1>, vector<4x128xf32>
    %36 = arith.truncf %35 : vector<4x128xf32> to vector<4x128xbf16>
    %c0_16 = arith.constant 0 : index
    %c0_17 = arith.constant 0 : index
    %37 = vector.load %arg5[%c0_16, %c0_17] : memref<4x128xbf16, #tpu.memory_space<vmem>>, vector<4x128xbf16>
    tpu.vector_store %arg5[%c0_16, %c0_17], %36 {strides = array<i32>} : memref<4x128xbf16, #tpu.memory_space<vmem>>, vector<4x128xbf16>,
    return
  }
  func.func @transform_0(%arg0: i32) -> (i32, i32) {
    %c0_i32 = arith.constant 0 : i32
    %c0_i32_0 = arith.constant 0 : i32
    %c0_i32_1 = arith.constant 0 : i32
    return %c0_i32, %c0_i32_0 : i32, i32
  }
  func.func @transform_1(%arg0: i32) -> (i32, i32) {
    %c0_i32 = arith.constant 0 : i32
    %c0_i32_0 = arith.constant 0 : i32
    %c0_i32_1 = arith.constant 0 : i32
    return %c0_i32, %c0_i32_0 : i32, i32
  }
  func.func @transform_2(%arg0: i32) -> (i32, i32) {
    %c0_i32 = arith.constant 0 : i32
    %c0_i32_0 = arith.constant 0 : i32
    %c0_i32_1 = arith.constant 0 : i32
    return %c0_i32, %c0_i32_0 : i32, i32
  }
  func.func @transform_3(%arg0: i32) -> (i32, i32) {
    %c0_i32 = arith.constant 0 : i32
    %c0_i32_0 = arith.constant 0 : i32
    %c0_i32_1 = arith.constant 0 : i32
    return %c0_i32, %c0_i32_0 : i32, i32
  }
  func.func @transform_4(%arg0: i32) -> (i32, i32) {
    %c0_i32 = arith.constant 0 : i32
    %c0_i32_0 = arith.constant 0 : i32
    %c0_i32_1 = arith.constant 0 : i32
    return %c0_i32, %c0_i32_0 : i32, i32
  }
}

module attributes {stable_mosaic.version = 11 : i64} {
  func.func @_gemm_bias_act_kernel(%arg0: i32, %arg1: memref<16x36xbf16, #tpu.memory_space<vmem>>, %arg2: memref<36x128xbf16, #tpu.memory_space<vmem>>, %arg3: memref<16x1xf32, #tpu.memory_space<vmem>>, %arg4: memref<16x128xbf16, #tpu.memory_space<vmem>>) attributes {dimension_semantics = [#tpu.dimension_semantics<parallel>], iteration_bounds = array<i64: 1>, scalar_prefetch = 0 : i64, scratch_operands = 0 : i64, tpu.core_type = #tpu.core_type<tc>, window_params = [{pipeline_mode = #tpu.pipeline_mode<synchronous>, transform_indices = @transform_0, window_bounds = array<i64: 16, 36>}, {transform_indices = @transform_1, window_bounds = array<i64: 36, 128>}, {pipeline_mode = #tpu.pipeline_mode<synchronous>, transform_indices = @transform_2, window_bounds = array<i64: 16, 1>}, {transform_indices = @transform_3, window_bounds = array<i64: 16, 128>}]} {
    %c0 = arith.constant 0 : index
    %c0_0 = arith.constant 0 : index
    %0 = vector.load %arg1[%c0, %c0_0] : memref<16x36xbf16, #tpu.memory_space<vmem>>, vector<16x36xbf16>
    %c0_1 = arith.constant 0 : index
    %c0_2 = arith.constant 0 : index
    %1 = vector.load %arg2[%c0_1, %c0_2] : memref<36x128xbf16, #tpu.memory_space<vmem>>, vector<36x128xbf16>
    %cst = arith.constant dense<0.000000e+00> : vector<16x128xf32>
    %2 = tpu.matmul %0, %1, %cst {dimension_numbers = #tpu.dot_dimension_numbers<[1], [0], [0], [1], [0, 0, 1, 1], [], []>} : vector<16x36xbf16>, vector<36x128xbf16>, vector<16x128xf32> -> vector<16x128xf32>
    %c0_3 = arith.constant 0 : index
    %c0_4 = arith.constant 0 : index
    %3 = vector.load %arg3[%c0_3, %c0_4] : memref<16x1xf32, #tpu.memory_space<vmem>>, vector<16x1xf32>
    %4 = vector.broadcast %3 : vector<16x1xf32> to vector<16x128xf32>
    %5 = arith.addf %2, %4 : vector<16x128xf32>
    %cst_5 = arith.constant 0.000000e+00 : f32
    %6 = vector.broadcast %cst_5 : f32 to vector<16x128xf32>
    %7 = arith.cmpf oge, %5, %6 : vector<16x128xf32>
    %cst_6 = arith.constant 1.000000e-01 : f32
    %8 = vector.broadcast %cst_6 : f32 to vector<16x128xf32>
    %9 = arith.mulf %8, %5 : vector<16x128xf32>
    %10 = arith.select %7, %5, %9 : vector<16x128xi1>, vector<16x128xf32>
    %11 = arith.truncf %10 : vector<16x128xf32> to vector<16x128xbf16>
    %c0_7 = arith.constant 0 : index
    %c0_8 = arith.constant 0 : index
    %12 = vector.load %arg4[%c0_7, %c0_8] : memref<16x128xbf16, #tpu.memory_space<vmem>>, vector<16x128xbf16>
    tpu.vector_store %arg4[%c0_7, %c0_8], %11 {strides = array<i32>} : memref<16x128xbf16, #tpu.memory_space<vmem>>, vector<16x128xbf16>,
    return
  }
  func.func @transform_0(%arg0: i32) -> (i32, i32) {
    %c0_i32 = arith.constant 0 : i32
    %c0_i32_0 = arith.constant 0 : i32
    %c0_i32_1 = arith.constant 0 : i32
    return %c0_i32, %c0_i32_0 : i32, i32
  }
  func.func @transform_1(%arg0: i32) -> (i32, i32) {
    %c0_i32 = arith.constant 0 : i32
    %c0_i32_0 = arith.constant 0 : i32
    return %c0_i32, %arg0 : i32, i32
  }
  func.func @transform_2(%arg0: i32) -> (i32, i32) {
    %c0_i32 = arith.constant 0 : i32
    %c0_i32_0 = arith.constant 0 : i32
    %c0_i32_1 = arith.constant 0 : i32
    return %c0_i32, %c0_i32_0 : i32, i32
  }
  func.func @transform_3(%arg0: i32) -> (i32, i32) {
    %c0_i32 = arith.constant 0 : i32
    %c0_i32_0 = arith.constant 0 : i32
    return %c0_i32, %arg0 : i32, i32
  }
}

module attributes {stable_mosaic.version = 11 : i64} {
  func.func @_fused_bn_kernel(%arg0: i32, %arg1: memref<4x36xbf16, #tpu.memory_space<vmem>>, %arg2: memref<36x128xbf16, #tpu.memory_space<vmem>>, %arg3: memref<4x1xf32, #tpu.memory_space<vmem>>, %arg4: memref<4x1xf32, #tpu.memory_space<vmem>>, %arg5: memref<4x128xbf16, #tpu.memory_space<vmem>>) attributes {dimension_semantics = [#tpu.dimension_semantics<arbitrary>], iteration_bounds = array<i64: 1>, scalar_prefetch = 0 : i64, scratch_operands = 0 : i64, tpu.core_type = #tpu.core_type<tc>, window_params = [{pipeline_mode = #tpu.pipeline_mode<synchronous>, transform_indices = @transform_0, window_bounds = array<i64: 4, 36>}, {pipeline_mode = #tpu.pipeline_mode<synchronous>, transform_indices = @transform_1, window_bounds = array<i64: 36, 128>}, {pipeline_mode = #tpu.pipeline_mode<synchronous>, transform_indices = @transform_2, window_bounds = array<i64: 4, 1>}, {pipeline_mode = #tpu.pipeline_mode<synchronous>, transform_indices = @transform_3, window_bounds = array<i64: 4, 1>}, {pipeline_mode = #tpu.pipeline_mode<synchronous>, transform_indices = @transform_4, window_bounds = array<i64: 4, 128>}]} {
    %c0 = arith.constant 0 : index
    %c0_0 = arith.constant 0 : index
    %0 = vector.load %arg1[%c0, %c0_0] : memref<4x36xbf16, #tpu.memory_space<vmem>>, vector<4x36xbf16>
    %c0_1 = arith.constant 0 : index
    %c0_2 = arith.constant 0 : index
    %1 = vector.load %arg2[%c0_1, %c0_2] : memref<36x128xbf16, #tpu.memory_space<vmem>>, vector<36x128xbf16>
    %cst = arith.constant dense<0.000000e+00> : vector<4x128xf32>
    %2 = tpu.matmul %0, %1, %cst {dimension_numbers = #tpu.dot_dimension_numbers<[1], [0], [0], [1], [0, 0, 1, 1], [], []>} : vector<4x36xbf16>, vector<36x128xbf16>, vector<4x128xf32> -> vector<4x128xf32>
    %3 = tpu.iota {dimensions = array<i32: 1>} : vector<4x128xi32>
    %c8_i32 = arith.constant 8 : i32
    %4 = vector.broadcast %c8_i32 : i32 to vector<4x128xi32>
    %5 = arith.cmpi slt, %3, %4 : vector<4x128xi32>
    %cst_3 = arith.constant 0.000000e+00 : f32
    %6 = vector.broadcast %cst_3 : f32 to vector<4x128xf32>
    %7 = arith.select %5, %2, %6 : vector<4x128xi1>, vector<4x128xf32>
    %cst_4 = arith.constant dense<0.000000e+00> : vector<4xf32>
    %8 = vector.multi_reduction <add>, %7, %cst_4 [1] : vector<4x128xf32> to vector<4xf32>
    %9 = vector.shape_cast %8 : vector<4xf32> to vector<4x1xf32>
    %cst_5 = arith.constant 1.250000e-01 : f32
    %10 = vector.broadcast %cst_5 : f32 to vector<4x1xf32>
    %11 = arith.mulf %9, %10 : vector<4x1xf32>
    %12 = vector.broadcast %11 : vector<4x1xf32> to vector<4x128xf32>
    %13 = arith.subf %2, %12 : vector<4x128xf32>
    %cst_6 = arith.constant 0.000000e+00 : f32
    %14 = vector.broadcast %cst_6 : f32 to vector<4x128xf32>
    %15 = arith.select %5, %13, %14 : vector<4x128xi1>, vector<4x128xf32>
    %16 = arith.mulf %15, %15 : vector<4x128xf32>
    %cst_7 = arith.constant dense<0.000000e+00> : vector<4xf32>
    %17 = vector.multi_reduction <add>, %16, %cst_7 [1] : vector<4x128xf32> to vector<4xf32>
    %18 = vector.shape_cast %17 : vector<4xf32> to vector<4x1xf32>
    %cst_8 = arith.constant 1.250000e-01 : f32
    %19 = vector.broadcast %cst_8 : f32 to vector<4x1xf32>
    %20 = arith.mulf %18, %19 : vector<4x1xf32>
    %c0_9 = arith.constant 0 : index
    %c0_10 = arith.constant 0 : index
    %21 = vector.load %arg3[%c0_9, %c0_10] : memref<4x1xf32, #tpu.memory_space<vmem>>, vector<4x1xf32>
    %cst_11 = arith.constant 9.99999974E-6 : f32
    %22 = vector.broadcast %cst_11 : f32 to vector<4x1xf32>
    %23 = arith.addf %20, %22 : vector<4x1xf32>
    %24 = math.rsqrt %23 : vector<4x1xf32>
    %25 = arith.mulf %21, %24 : vector<4x1xf32>
    %26 = vector.broadcast %25 : vector<4x1xf32> to vector<4x128xf32>
    %27 = arith.mulf %15, %26 : vector<4x128xf32>
    %c0_12 = arith.constant 0 : index
    %c0_13 = arith.constant 0 : index
    %28 = vector.load %arg4[%c0_12, %c0_13] : memref<4x1xf32, #tpu.memory_space<vmem>>, vector<4x1xf32>
    %29 = vector.broadcast %28 : vector<4x1xf32> to vector<4x128xf32>
    %30 = arith.addf %27, %29 : vector<4x128xf32>
    %cst_14 = arith.constant 0.000000e+00 : f32
    %31 = vector.broadcast %cst_14 : f32 to vector<4x128xf32>
    %32 = arith.cmpf oge, %30, %31 : vector<4x128xf32>
    %cst_15 = arith.constant 1.000000e-01 : f32
    %33 = vector.broadcast %cst_15 : f32 to vector<4x128xf32>
    %34 = arith.mulf %33, %30 : vector<4x128xf32>
    %35 = arith.select %32, %30, %34 : vector<4x128xi1>, vector<4x128xf32>
    %36 = arith.truncf %35 : vector<4x128xf32> to vector<4x128xbf16>
    %c0_16 = arith.constant 0 : index
    %c0_17 = arith.constant 0 : index
    %37 = vector.load %arg5[%c0_16, %c0_17] : memref<4x128xbf16, #tpu.memory_space<vmem>>, vector<4x128xbf16>
    tpu.vector_store %arg5[%c0_16, %c0_17], %36 {strides = array<i32>} : memref<4x128xbf16, #tpu.memory_space<vmem>>, vector<4x128xbf16>,
    return
  }
  func.func @transform_0(%arg0: i32) -> (i32, i32) {
    %c0_i32 = arith.constant 0 : i32
    %c0_i32_0 = arith.constant 0 : i32
    %c0_i32_1 = arith.constant 0 : i32
    return %c0_i32, %c0_i32_0 : i32, i32
  }
  func.func @transform_1(%arg0: i32) -> (i32, i32) {
    %c0_i32 = arith.constant 0 : i32
    %c0_i32_0 = arith.constant 0 : i32
    %c0_i32_1 = arith.constant 0 : i32
    return %c0_i32, %c0_i32_0 : i32, i32
  }
  func.func @transform_2(%arg0: i32) -> (i32, i32) {
    %c0_i32 = arith.constant 0 : i32
    %c0_i32_0 = arith.constant 0 : i32
    %c0_i32_1 = arith.constant 0 : i32
    return %c0_i32, %c0_i32_0 : i32, i32
  }
  func.func @transform_3(%arg0: i32) -> (i32, i32) {
    %c0_i32 = arith.constant 0 : i32
    %c0_i32_0 = arith.constant 0 : i32
    %c0_i32_1 = arith.constant 0 : i32
    return %c0_i32, %c0_i32_0 : i32, i32
  }
  func.func @transform_4(%arg0: i32) -> (i32, i32) {
    %c0_i32 = arith.constant 0 : i32
    %c0_i32_0 = arith.constant 0 : i32
    %c0_i32_1 = arith.constant 0 : i32
    return %c0_i32, %c0_i32_0 : i32, i32
  }
}

module attributes {stable_mosaic.version = 11 : i64} {
  func.func @_gemm_bias_act_kernel(%arg0: i32, %arg1: memref<16x72xbf16, #tpu.memory_space<vmem>>, %arg2: memref<72x128xbf16, #tpu.memory_space<vmem>>, %arg3: memref<16x1xf32, #tpu.memory_space<vmem>>, %arg4: memref<16x128xbf16, #tpu.memory_space<vmem>>) attributes {dimension_semantics = [#tpu.dimension_semantics<parallel>], iteration_bounds = array<i64: 1>, scalar_prefetch = 0 : i64, scratch_operands = 0 : i64, tpu.core_type = #tpu.core_type<tc>, window_params = [{pipeline_mode = #tpu.pipeline_mode<synchronous>, transform_indices = @transform_0, window_bounds = array<i64: 16, 72>}, {transform_indices = @transform_1, window_bounds = array<i64: 72, 128>}, {pipeline_mode = #tpu.pipeline_mode<synchronous>, transform_indices = @transform_2, window_bounds = array<i64: 16, 1>}, {transform_indices = @transform_3, window_bounds = array<i64: 16, 128>}]} {
    %c0 = arith.constant 0 : index
    %c0_0 = arith.constant 0 : index
    %0 = vector.load %arg1[%c0, %c0_0] : memref<16x72xbf16, #tpu.memory_space<vmem>>, vector<16x72xbf16>
    %c0_1 = arith.constant 0 : index
    %c0_2 = arith.constant 0 : index
    %1 = vector.load %arg2[%c0_1, %c0_2] : memref<72x128xbf16, #tpu.memory_space<vmem>>, vector<72x128xbf16>
    %cst = arith.constant dense<0.000000e+00> : vector<16x128xf32>
    %2 = tpu.matmul %0, %1, %cst {dimension_numbers = #tpu.dot_dimension_numbers<[1], [0], [0], [1], [0, 0, 1, 1], [], []>} : vector<16x72xbf16>, vector<72x128xbf16>, vector<16x128xf32> -> vector<16x128xf32>
    %c0_3 = arith.constant 0 : index
    %c0_4 = arith.constant 0 : index
    %3 = vector.load %arg3[%c0_3, %c0_4] : memref<16x1xf32, #tpu.memory_space<vmem>>, vector<16x1xf32>
    %4 = vector.broadcast %3 : vector<16x1xf32> to vector<16x128xf32>
    %5 = arith.addf %2, %4 : vector<16x128xf32>
    %cst_5 = arith.constant 0.000000e+00 : f32
    %6 = vector.broadcast %cst_5 : f32 to vector<16x128xf32>
    %7 = arith.cmpf oge, %5, %6 : vector<16x128xf32>
    %cst_6 = arith.constant 1.000000e-01 : f32
    %8 = vector.broadcast %cst_6 : f32 to vector<16x128xf32>
    %9 = arith.mulf %8, %5 : vector<16x128xf32>
    %10 = arith.select %7, %5, %9 : vector<16x128xi1>, vector<16x128xf32>
    %11 = arith.truncf %10 : vector<16x128xf32> to vector<16x128xbf16>
    %c0_7 = arith.constant 0 : index
    %c0_8 = arith.constant 0 : index
    %12 = vector.load %arg4[%c0_7, %c0_8] : memref<16x128xbf16, #tpu.memory_space<vmem>>, vector<16x128xbf16>
    tpu.vector_store %arg4[%c0_7, %c0_8], %11 {strides = array<i32>} : memref<16x128xbf16, #tpu.memory_space<vmem>>, vector<16x128xbf16>,
    return
  }
  func.func @transform_0(%arg0: i32) -> (i32, i32) {
    %c0_i32 = arith.constant 0 : i32
    %c0_i32_0 = arith.constant 0 : i32
    %c0_i32_1 = arith.constant 0 : i32
    return %c0_i32, %c0_i32_0 : i32, i32
  }
  func.func @transform_1(%arg0: i32) -> (i32, i32) {
    %c0_i32 = arith.constant 0 : i32
    %c0_i32_0 = arith.constant 0 : i32
    return %c0_i32, %arg0 : i32, i32
  }
  func.func @transform_2(%arg0: i32) -> (i32, i32) {
    %c0_i32 = arith.constant 0 : i32
    %c0_i32_0 = arith.constant 0 : i32
    %c0_i32_1 = arith.constant 0 : i32
    return %c0_i32, %c0_i32_0 : i32, i32
  }
  func.func @transform_3(%arg0: i32) -> (i32, i32) {
    %c0_i32 = arith.constant 0 : i32
    %c0_i32_0 = arith.constant 0 : i32
    return %c0_i32, %arg0 : i32, i32
  }
}

module attributes {stable_mosaic.version = 11 : i64} {
  func.func @_gemm_bias_act_kernel(%arg0: i32, %arg1: memref<4x72xbf16, #tpu.memory_space<vmem>>, %arg2: memref<72x256xbf16, #tpu.memory_space<vmem>>, %arg3: memref<4x1xf32, #tpu.memory_space<vmem>>, %arg4: memref<4x256xf32, #tpu.memory_space<vmem>>) attributes {dimension_semantics = [#tpu.dimension_semantics<parallel>], iteration_bounds = array<i64: 2>, scalar_prefetch = 0 : i64, scratch_operands = 0 : i64, tpu.core_type = #tpu.core_type<tc>, window_params = [{pipeline_mode = #tpu.pipeline_mode<synchronous>, transform_indices = @transform_0, window_bounds = array<i64: 4, 72>}, {transform_indices = @transform_1, window_bounds = array<i64: 72, 256>}, {pipeline_mode = #tpu.pipeline_mode<synchronous>, transform_indices = @transform_2, window_bounds = array<i64: 4, 1>}, {transform_indices = @transform_3, window_bounds = array<i64: 4, 256>}]} {
    %c0 = arith.constant 0 : index
    %c0_0 = arith.constant 0 : index
    %0 = vector.load %arg1[%c0, %c0_0] : memref<4x72xbf16, #tpu.memory_space<vmem>>, vector<4x72xbf16>
    %c0_1 = arith.constant 0 : index
    %c0_2 = arith.constant 0 : index
    %1 = vector.load %arg2[%c0_1, %c0_2] : memref<72x256xbf16, #tpu.memory_space<vmem>>, vector<72x256xbf16>
    %cst = arith.constant dense<0.000000e+00> : vector<4x256xf32>
    %2 = tpu.matmul %0, %1, %cst {dimension_numbers = #tpu.dot_dimension_numbers<[1], [0], [0], [1], [0, 0, 1, 1], [], []>} : vector<4x72xbf16>, vector<72x256xbf16>, vector<4x256xf32> -> vector<4x256xf32>
    %c0_3 = arith.constant 0 : index
    %c0_4 = arith.constant 0 : index
    %3 = vector.load %arg3[%c0_3, %c0_4] : memref<4x1xf32, #tpu.memory_space<vmem>>, vector<4x1xf32>
    %4 = vector.broadcast %3 : vector<4x1xf32> to vector<4x256xf32>
    %5 = arith.addf %2, %4 : vector<4x256xf32>
    %c0_5 = arith.constant 0 : index
    %c0_6 = arith.constant 0 : index
    %6 = vector.load %arg4[%c0_5, %c0_6] : memref<4x256xf32, #tpu.memory_space<vmem>>, vector<4x256xf32>
    tpu.vector_store %arg4[%c0_5, %c0_6], %5 {strides = array<i32>} : memref<4x256xf32, #tpu.memory_space<vmem>>, vector<4x256xf32>,
    return
  }
  func.func @transform_0(%arg0: i32) -> (i32, i32) {
    %c0_i32 = arith.constant 0 : i32
    %c0_i32_0 = arith.constant 0 : i32
    %c0_i32_1 = arith.constant 0 : i32
    return %c0_i32, %c0_i32_0 : i32, i32
  }
  func.func @transform_1(%arg0: i32) -> (i32, i32) {
    %c0_i32 = arith.constant 0 : i32
    %c0_i32_0 = arith.constant 0 : i32
    return %c0_i32, %arg0 : i32, i32
  }
  func.func @transform_2(%arg0: i32) -> (i32, i32) {
    %c0_i32 = arith.constant 0 : i32
    %c0_i32_0 = arith.constant 0 : i32
    %c0_i32_1 = arith.constant 0 : i32
    return %c0_i32, %c0_i32_0 : i32, i32
  }
  func.func @transform_3(%arg0: i32) -> (i32, i32) {
    %c0_i32 = arith.constant 0 : i32
    %c0_i32_0 = arith.constant 0 : i32
    return %c0_i32, %arg0 : i32, i32
  }
}

</mosaic_0001>

<bundles_post_ra>
// kernel: tile.28
= control target key start
LH: loop header
LB: loop body
LE: loop exit
PB: predicated region body
PF: predicated region fallthrough
CT: control target
= control target key end

     0   :  { %s22_s0 = inlined_call_operand.vmem [shape: f32[4], index: 0, kind: input, shape index: {}]   ;;  %s23_s1 = inlined_call_operand.vmem [shape: f32[4,4], index: 1, kind: output, shape index: {}]  }
   0x1   :  { %v4_v0 = vld [vmem:[%s22_s0] ss:$0 sm:$0xff] }
   0x2   :  { %5 = vst [vmem:[%s23_s1] sm:$0xf] %v4_v0 }

// kernel: tile.0
= control target key start
LH: loop header
LB: loop body
LE: loop exit
PB: predicated region body
PF: predicated region fallthrough
CT: control target
= control target key end

     0   :  { %s34_s8 = smov 125   ;;  %vm7_vm0 = vcmask 7168   ;;  %s35_s11 = smov 126   ;;  %s61_s0 = inlined_call_operand.vmem [shape: f32[4,4], index: 0, kind: input, shape index: {}]   ;;  %s62_s1 = inlined_call_operand.vmem [shape: f32[16,1], index: 1, kind: output, shape index: {}]  }
   0x1   :  { %v4_v0 = vld [vmem:[%s61_s0] sm:$0xf]  ;;  %s33_s0 = smov 127  }
   0x2   :  { %5 = vst [vmem:[#allocation0] sm:$0xf] %v4_v0 }
   0x9   :  { %v9_v1 = vld [vmem:[#allocation0] sm:$0xf]  }
   0xa   :  { %v21_v2 = vld [vmem:[#allocation0] sm:$0xf]   ;;  %10 = vrot.lane.b32.xlu0 %v9_v1, %s33_s0 }
   0xb   :  { %22 = vrot.lane.b32.xlu1 %v21_v2, %s34_s8  ;;  %v6_v3 = vld [vmem:[#allocation0] sm:$0xf]  }
   0xc   :  { %v15_v4 = vld [vmem:[#allocation0] sm:$0xf]   ;;  %8 = vst.msk [vmem:[%s62_s1] ss:$4 sm:$0xf] %vm7_vm0, %v6_v3  }
   0xe   :  { %16 = vrot.lane.b32.xlu0 %v15_v4, %s35_s11 }
  0x7c   :  { %v11_v5 = vpop.permute.xlu0 %10  }
  0x7d   :  { %v23_v6 = vpop.permute.xlu1 %22   ;;  %27 = vst.msk [vmem:[%s62_s1 + $0x1] ss:$4 sm:$0xf] %vm7_vm0, %v11_v5  }
  0x7e   :  { %29 = vst.msk [vmem:[%s62_s1 + $0x3] ss:$4 sm:$0xf] %vm7_vm0, %v23_v6  }
  0x80   :  { %v17_v7 = vpop.permute.xlu0 %16  }
  0x81   :  { %28 = vst.msk [vmem:[%s62_s1 + $0x2] ss:$4 sm:$0xf] %vm7_vm0, %v17_v7  }

// kernel: unet_forward.9
= control target key start
LH: loop header
LB: loop body
LE: loop exit
PB: predicated region body
PF: predicated region fallthrough
CT: control target
= control target key end

     0   :  { %v170_v0 = vmov 0.0   ;;  %vm171_vm0 = vmmov 0   ;;  %vm51_vm1 = vcmask 523264   ;;  %vm99_vm2 = vcmask 1043456   ;;  %s222_s1 = inlined_call_operand.vmem [shape: bf16[64,128], index: 1, kind: input, shape index: {}]   ;;  %s223_s0 = inlined_call_operand.vmem [shape: bf16[4,64], index: 0, kind: input, shape index: {}]   ;;  %s224_s2 = inlined_call_operand.vmem [shape: f32[4,1], index: 2, kind: input, shape index: {}]   ;;  %s225_s3 = inlined_call_operand.vmem [shape: f32[4,1], index: 3, kind: input, shape index: {}]   ;;  %s226_s4 = inlined_call_operand.vmem [shape: bf16[4,128], index: 4, kind: output, shape index: {}]  }
   0x1   :  { %147 = vmatprep.subr.bf16.mxu0 %v170_v0  ;;  %v164_v1 = vld [vmem:[%s222_s1] sm:$0xff]   ;;  %155 = vmatprep.mubr.msk.bf16.mxu0 %vm171_vm0, %v170_v0  ;;  %v165_v2 = vld [vmem:[%s222_s1 + $0x8] sm:$0xff]   ;;  %v166_v3 = vld [vmem:[%s222_s1 + $0x10] sm:$0xff]   ;;  %v172_v16 = vmov 0  }
   0x2   :  { %148 = vmatpush3.bf16.msra.mxu0 %v164_v1  ;;  %v167_v4 = vld [vmem:[%s222_s1 + $0x18] sm:$0xff]   ;;  %v18_v5 = vld [vmem:[%s223_s0] sm:$0x3]  ;;  %162 = vset.pattern.permute.xlu1 %v172_v16 }
   0x3   :  { %149 = vmatprep.subr.bf16.mxu0 %v170_v0  ;;  %163 = vset.pattern.permute.xlu0 %v172_v16  ;;  %v111_v20 = vld [vmem:[%s224_s2] sm:$0xf] }
   0x4   :  { %v121_v23 = vld [vmem:[%s225_s3] sm:$0xf] }
   0x6   :  { %150 = vmatpush3.bf16.msra.mxu0 %v165_v2 }
   0x7   :  { %151 = vmatprep.subr.bf16.mxu0 %v170_v0 }
   0xa   :  { %152 = vmatpush3.bf16.msra.mxu0 %v166_v3 }
   0xb   :  { %153 = vmatprep.subr.bf16.mxu0 %v170_v0 }
   0xe   :  { %154 = vmatpush3.bf16.msra.mxu0 %v167_v4 }
  0x11   :  { %156 = vmatmul.mubr.msk.bf16.vlgmr.msra.gmra.mrb[0].mxu0 %vm51_vm1, %v18_v5 }
  0xe4   :  { %v89_v6 = vpop.f32.mrb[0].mxu0 }
  0xe5   :  { %v157_v7 = vpop.f32.mrb[1].mxu0  ;;  %v100_v8 = vsel %vm99_vm2, %v89_v6, 0.0 }
  0xe6   :  { %101 = vadd.xlane.f32.xlu0 %v100_v8  ;;  %v92_v9 = vpop.f32.mrb[2].mxu0 }
  0xe7   :  { %v158_v10 = vpop.f32.mrb[3].mxu0 }
 0x173   :  { %v102_v11 = vpop.xlane.xlu0 %101 }
 0x174   :  { %v103_v12 = vmul.f32 0.0078125, %v102_v11 }
 0x176   :  { %v104_v13 = vsub.f32 %v89_v6, %v103_v12 }
 0x178   :  { %v106_v14 = vmul.f32 %v104_v13, %v104_v13 }
 0x17a   :  { %v107_v15 = vsel %vm99_vm2, %v106_v14, 0.0 }
 0x17b   :  { %108 = vadd.xlane.f32.xlu0 %v107_v15 }
 0x208   :  { %v109_v17 = vpop.xlane.xlu0 %108 }
 0x209   :  { %v110_v18 = vmul.f32 0.0078125, %v109_v17 }
 0x20b   :  { %v112_v19 = vadd.f32 1e-05, %v110_v18 }
 0x20d   :  { %168 = vrsqrt.f32 %v112_v19 }
 0x217   :  { %v169_v21 = vpop.eup %168 }
 0x218   :  { %v114_v22 = vmul.f32 %v169_v21, %v111_v20 }
 0x21a   :  { %117 = vperm.xlu1 %162, %v114_v22  }
 0x21e   :  { %124 = vperm.xlu1 %162, %v121_v23  }
 0x299   :  { %v118_v24 = vpop.permute.xlu1 %117 }
 0x29a   :  { %v120_v25 = vmul.f32 %v118_v24, %v104_v13 }
 0x29d   :  { %v125_v26 = vpop.permute.xlu1 %124 }
 0x29e   :  { %v127_v27 = vadd.f32 %v125_v26, %v120_v25 }
 0x2a0   :  { %vm128_vm3 = vcmp.ge.f32.partialorder %v127_v27, 0.0  ;;  %v129_v28 = vmul.f32 0.1, %v127_v27 }
 0x2a2   :  { %v130_v29 = vsel %vm128_vm3, %v127_v27, %v129_v28 }
 0x2a3   :  { %v131_v30 = vpack.c.bf16 %v130_v29, %v130_v29 }
 0x2a5   :  { %132 = vst [vmem:[%s226_s4] sm:$0x3] %v131_v30 }

// kernel: unet_forward.10
= control target key start
LH: loop header
LB: loop body
LE: loop exit
PB: predicated region body
PF: predicated region fallthrough
CT: control target
= control target key end

     0   :  { %v170_v0 = vmov 0.0   ;;  %vm171_vm0 = vmmov 0   ;;  %vm51_vm1 = vcmask 523264   ;;  %v95_v6 = vlaneseq  ;;  %s222_s1 = inlined_call_operand.vmem [shape: bf16[64,128], index: 1, kind: input, shape index: {}]   ;;  %s223_s0 = inlined_call_operand.vmem [shape: bf16[4,64], index: 0, kind: input, shape index: {}]   ;;  %s224_s2 = inlined_call_operand.vmem [shape: f32[4,1], index: 2, kind: input, shape index: {}]   ;;  %s225_s3 = inlined_call_operand.vmem [shape: f32[4,1], index: 3, kind: input, shape index: {}]   ;;  %s226_s4 = inlined_call_operand.vmem [shape: bf16[4,128], index: 4, kind: output, shape index: {}]  }
   0x1   :  { %147 = vmatprep.subr.bf16.mxu0 %v170_v0  ;;  %v164_v1 = vld [vmem:[%s222_s1] sm:$0xff]   ;;  %155 = vmatprep.mubr.msk.bf16.mxu0 %vm171_vm0, %v170_v0  ;;  %v165_v2 = vld [vmem:[%s222_s1 + $0x8] sm:$0xff]   ;;  %v166_v3 = vld [vmem:[%s222_s1 + $0x10] sm:$0xff]   ;;  %vm99_vm3 = vcmask 1043456   ;;  %v172_v20 = vmov 0  }
   0x2   :  { %148 = vmatpush3.bf16.msra.mxu0 %v164_v1  ;;  %v167_v4 = vld [vmem:[%s222_s1 + $0x18] sm:$0xff]   ;;  %v18_v5 = vld [vmem:[%s223_s0] sm:$0x3]  ;;  %v96_v7 = vand.u32 127, %v95_v6  ;;  %162 = vset.pattern.permute.xlu1 %v172_v20 }
   0x3   :  { %149 = vmatprep.subr.bf16.mxu0 %v170_v0  ;;  %163 = vset.pattern.permute.xlu0 %v172_v20  ;;  %v111_v24 = vld [vmem:[%s224_s2] sm:$0xf] }
   0x4   :  { %vm97_vm2 = vcmp.lt.s32.totalorder %v96_v7, 32  ;;  %v121_v27 = vld [vmem:[%s225_s3] sm:$0xf] }
   0x6   :  { %150 = vmatpush3.bf16.msra.mxu0 %v165_v2 }
   0x7   :  { %151 = vmatprep.subr.bf16.mxu0 %v170_v0 }
   0xa   :  { %152 = vmatpush3.bf16.msra.mxu0 %v166_v3 }
   0xb   :  { %153 = vmatprep.subr.bf16.mxu0 %v170_v0 }
   0xe   :  { %154 = vmatpush3.bf16.msra.mxu0 %v167_v4 }
  0x11   :  { %156 = vmatmul.mubr.msk.bf16.vlgmr.msra.gmra.mrb[0].mxu0 %vm51_vm1, %v18_v5 }
  0xe4   :  { %v89_v8 = vpop.f32.mrb[0].mxu0 }
  0xe5   :  { %v157_v9 = vpop.f32.mrb[1].mxu0  ;;  %v98_v10 = vsel %vm97_vm2, %v89_v8, 0.0 }
  0xe6   :  { %v92_v11 = vpop.f32.mrb[2].mxu0  ;;  %v100_v12 = vsel %vm99_vm3, %v98_v10, 0.0 }
  0xe7   :  { %101 = vadd.xlane.f32.xlu0 %v100_v12  ;;  %v158_v13 = vpop.f32.mrb[3].mxu0 }
 0x174   :  { %v102_v14 = vpop.xlane.xlu0 %101 }
 0x175   :  { %v103_v15 = vmul.f32 0.03125, %v102_v14 }
 0x177   :  { %v104_v16 = vsub.f32 %v89_v8, %v103_v15 }
 0x179   :  { %v105_v17 = vsel %vm97_vm2, %v104_v16, 0.0 }
 0x17a   :  { %v106_v18 = vmul.f32 %v105_v17, %v105_v17 }
 0x17c   :  { %v107_v19 = vsel %vm99_vm3, %v106_v18, 0.0 }
 0x17d   :  { %108 = vadd.xlane.f32.xlu0 %v107_v19 }
 0x20a   :  { %v109_v21 = vpop.xlane.xlu0 %108 }
 0x20b   :  { %v110_v22 = vmul.f32 0.03125, %v109_v21 }
 0x20d   :  { %v112_v23 = vadd.f32 1e-05, %v110_v22 }
 0x20f   :  { %168 = vrsqrt.f32 %v112_v23 }
 0x219   :  { %v169_v25 = vpop.eup %168 }
 0x21a   :  { %v114_v26 = vmul.f32 %v169_v25, %v111_v24 }
 0x21c   :  { %117 = vperm.xlu1 %162, %v114_v26  }
 0x220   :  { %124 = vperm.xlu1 %162, %v121_v27  }
 0x29b   :  { %v118_v28 = vpop.permute.xlu1 %117 }
 0x29c   :  { %v120_v29 = vmul.f32 %v118_v28, %v105_v17 }
 0x29f   :  { %v125_v30 = vpop.permute.xlu1 %124 }
 0x2a0   :  { %v127_v31 = vadd.f32 %v125_v30, %v120_v29 }
 0x2a2   :  { %vm128_vm4 = vcmp.ge.f32.partialorder %v127_v31, 0.0  ;;  %v129_v32 = vmul.f32 0.1, %v127_v31 }
 0x2a4   :  { %v130_v33 = vsel %vm128_vm4, %v127_v31, %v129_v32 }
 0x2a5   :  { %v131_v34 = vpack.c.bf16 %v130_v33, %v130_v33 }
 0x2a7   :  { %132 = vst [vmem:[%s226_s4] sm:$0x3] %v131_v34 }

// kernel: unet_forward.11
= control target key start
LH: loop header
LB: loop body
LE: loop exit
PB: predicated region body
PF: predicated region fallthrough
CT: control target
= control target key end

     0   :  { %v157_v0 = vmov 0.0   ;;  %vm158_vm0 = vmmov 0   ;;  %vm43_vm1 = vcmask 1041408   ;;  %vm39_vm2 = vcmask 293888   ;;  %s206_s1 = inlined_call_operand.vmem [shape: bf16[36,128], index: 1, kind: input, shape index: {}]   ;;  %s207_s0 = inlined_call_operand.vmem [shape: bf16[4,36], index: 0, kind: input, shape index: {}]   ;;  %s208_s2 = inlined_call_operand.vmem [shape: f32[4,1], index: 2, kind: input, shape index: {}]   ;;  %s209_s3 = inlined_call_operand.vmem [shape: f32[4,1], index: 3, kind: input, shape index: {}]   ;;  %s210_s4 = inlined_call_operand.vmem [shape: bf16[4,128], index: 4, kind: output, shape index: {}]  }
   0x1   :  { %137 = vmatprep.subr.bf16.mxu0 %v157_v0  ;;  %v152_v1 = vld [vmem:[%s206_s1] sm:$0xff]   ;;  %143 = vmatprep.mubr.msk.bf16.mxu0 %vm158_vm0, %v157_v0  ;;  %v153_v2 = vld [vmem:[%s206_s1 + $0x8] sm:$0xff]   ;;  %v154_v3 = vld [vmem:[%s206_s1 + $0x10] ss:$0 sps:$4 sm:$0x33]   ;;  %v87_v6 = vlaneseq  ;;  %vm91_vm4 = vcmask 1043456  }
   0x2   :  { %138 = vmatpush3.bf16.msra.mxu0 %v152_v1  ;;  %v45_v4 = vsel %vm43_vm1, %v154_v3, 0  ;;  %v18_v5 = vld [vmem:[%s207_s0] sm:$0x3]  ;;  %v159_v20 = vmov 0  }
   0x3   :  { %139 = vmatprep.subr.bf16.mxu0 %v157_v0  ;;  %v88_v7 = vand.u32 127, %v87_v6  ;;  %150 = vset.pattern.permute.xlu1 %v159_v20  ;;  %v103_v24 = vld [vmem:[%s208_s2] sm:$0xf] }
   0x4   :  { %151 = vset.pattern.permute.xlu0 %v159_v20  ;;  %v113_v27 = vld [vmem:[%s209_s3] sm:$0xf] }
   0x5   :  { %vm89_vm3 = vcmp.lt.s32.totalorder %v88_v7, 32 }
   0x6   :  { %140 = vmatpush3.bf16.msra.mxu0 %v153_v2 }
   0x7   :  { %141 = vmatprep.subr.bf16.mxu0 %v157_v0 }
   0xa   :  { %142 = vmatpush3.bf16.msra.mxu0 %v45_v4 }
   0xd   :  { %144 = vmatmul.mubr.msk.bf16.vlgmr.msra.gmra.mrb[0].mxu0 %vm39_vm2, %v18_v5 }
  0xe0   :  { %v81_v8 = vpop.f32.mrb[0].mxu0 }
  0xe1   :  { %v145_v9 = vpop.f32.mrb[1].mxu0  ;;  %v90_v10 = vsel %vm89_vm3, %v81_v8, 0.0 }
  0xe2   :  { %v84_v11 = vpop.f32.mrb[2].mxu0  ;;  %v92_v12 = vsel %vm91_vm4, %v90_v10, 0.0 }
  0xe3   :  { %93 = vadd.xlane.f32.xlu0 %v92_v12  ;;  %v146_v13 = vpop.f32.mrb[3].mxu0 }
 0x170   :  { %v94_v14 = vpop.xlane.xlu0 %93 }
 0x171   :  { %v95_v15 = vmul.f32 0.03125, %v94_v14 }
 0x173   :  { %v96_v16 = vsub.f32 %v81_v8, %v95_v15 }
 0x175   :  { %v97_v17 = vsel %vm89_vm3, %v96_v16, 0.0 }
 0x176   :  { %v98_v18 = vmul.f32 %v97_v17, %v97_v17 }
 0x178   :  { %v99_v19 = vsel %vm91_vm4, %v98_v18, 0.0 }
 0x179   :  { %100 = vadd.xlane.f32.xlu0 %v99_v19 }
 0x206   :  { %v101_v21 = vpop.xlane.xlu0 %100 }
 0x207   :  { %v102_v22 = vmul.f32 0.03125, %v101_v21 }
 0x209   :  { %v104_v23 = vadd.f32 1e-05, %v102_v22 }
 0x20b   :  { %155 = vrsqrt.f32 %v104_v23 }
 0x215   :  { %v156_v25 = vpop.eup %155 }
 0x216   :  { %v106_v26 = vmul.f32 %v156_v25, %v103_v24 }
 0x218   :  { %109 = vperm.xlu1 %150, %v106_v26  }
 0x21c   :  { %116 = vperm.xlu1 %150, %v113_v27  }
 0x297   :  { %v110_v28 = vpop.permute.xlu1 %109 }
 0x298   :  { %v112_v29 = vmul.f32 %v110_v28, %v97_v17 }
 0x29b   :  { %v117_v30 = vpop.permute.xlu1 %116 }
 0x29c   :  { %v119_v31 = vadd.f32 %v117_v30, %v112_v29 }
 0x29e   :  { %vm120_vm5 = vcmp.ge.f32.partialorder %v119_v31, 0.0  ;;  %v121_v32 = vmul.f32 0.1, %v119_v31 }
 0x2a0   :  { %v122_v33 = vsel %vm120_vm5, %v119_v31, %v121_v32 }
 0x2a1   :  { %v123_v34 = vpack.c.bf16 %v122_v33, %v122_v33 }
 0x2a3   :  { %124 = vst [vmem:[%s210_s4] sm:$0x3] %v123_v34 }

// kernel: unet_forward.12
= control target key start
LH: loop header
LB: loop body
LE: loop exit
PB: predicated region body
PF: predicated region fallthrough
CT: control target
= control target key end

     0   :  { %v170_v0 = vmov 0.0   ;;  %vm171_vm0 = vmmov 0   ;;  %vm51_vm1 = vcmask 523264   ;;  %v95_v6 = vlaneseq  ;;  %s222_s1 = inlined_call_operand.vmem [shape: bf16[64,128], index: 1, kind: input, shape index: {}]   ;;  %s223_s0 = inlined_call_operand.vmem [shape: bf16[4,64], index: 0, kind: input, shape index: {}]   ;;  %s224_s2 = inlined_call_operand.vmem [shape: f32[4,1], index: 2, kind: input, shape index: {}]   ;;  %s225_s3 = inlined_call_operand.vmem [shape: f32[4,1], index: 3, kind: input, shape index: {}]   ;;  %s226_s4 = inlined_call_operand.vmem [shape: bf16[4,128], index: 4, kind: output, shape index: {}]  }
   0x1   :  { %147 = vmatprep.subr.bf16.mxu0 %v170_v0  ;;  %v164_v1 = vld [vmem:[%s222_s1] sm:$0xff]   ;;  %155 = vmatprep.mubr.msk.bf16.mxu0 %vm171_vm0, %v170_v0  ;;  %v165_v2 = vld [vmem:[%s222_s1 + $0x8] sm:$0xff]   ;;  %v166_v3 = vld [vmem:[%s222_s1 + $0x10] sm:$0xff]   ;;  %vm99_vm3 = vcmask 1043456   ;;  %v172_v20 = vmov 0  }
   0x2   :  { %148 = vmatpush3.bf16.msra.mxu0 %v164_v1  ;;  %v167_v4 = vld [vmem:[%s222_s1 + $0x18] sm:$0xff]   ;;  %v18_v5 = vld [vmem:[%s223_s0] sm:$0x3]  ;;  %v96_v7 = vand.u32 127, %v95_v6  ;;  %162 = vset.pattern.permute.xlu1 %v172_v20 }
   0x3   :  { %149 = vmatprep.subr.bf16.mxu0 %v170_v0  ;;  %163 = vset.pattern.permute.xlu0 %v172_v20  ;;  %v111_v24 = vld [vmem:[%s224_s2] sm:$0xf] }
   0x4   :  { %vm97_vm2 = vcmp.lt.s32.totalorder %v96_v7, 8  ;;  %v121_v27 = vld [vmem:[%s225_s3] sm:$0xf] }
   0x6   :  { %150 = vmatpush3.bf16.msra.mxu0 %v165_v2 }
   0x7   :  { %151 = vmatprep.subr.bf16.mxu0 %v170_v0 }
   0xa   :  { %152 = vmatpush3.bf16.msra.mxu0 %v166_v3 }
   0xb   :  { %153 = vmatprep.subr.bf16.mxu0 %v170_v0 }
   0xe   :  { %154 = vmatpush3.bf16.msra.mxu0 %v167_v4 }
  0x11   :  { %156 = vmatmul.mubr.msk.bf16.vlgmr.msra.gmra.mrb[0].mxu0 %vm51_vm1, %v18_v5 }
  0xe4   :  { %v89_v8 = vpop.f32.mrb[0].mxu0 }
  0xe5   :  { %v157_v9 = vpop.f32.mrb[1].mxu0  ;;  %v98_v10 = vsel %vm97_vm2, %v89_v8, 0.0 }
  0xe6   :  { %v92_v11 = vpop.f32.mrb[2].mxu0  ;;  %v100_v12 = vsel %vm99_vm3, %v98_v10, 0.0 }
  0xe7   :  { %101 = vadd.xlane.f32.xlu0 %v100_v12  ;;  %v158_v13 = vpop.f32.mrb[3].mxu0 }
 0x174   :  { %v102_v14 = vpop.xlane.xlu0 %101 }
 0x175   :  { %v103_v15 = vmul.f32 0.125, %v102_v14 }
 0x177   :  { %v104_v16 = vsub.f32 %v89_v8, %v103_v15 }
 0x179   :  { %v105_v17 = vsel %vm97_vm2, %v104_v16, 0.0 }
 0x17a   :  { %v106_v18 = vmul.f32 %v105_v17, %v105_v17 }
 0x17c   :  { %v107_v19 = vsel %vm99_vm3, %v106_v18, 0.0 }
 0x17d   :  { %108 = vadd.xlane.f32.xlu0 %v107_v19 }
 0x20a   :  { %v109_v21 = vpop.xlane.xlu0 %108 }
 0x20b   :  { %v110_v22 = vmul.f32 0.125, %v109_v21 }
 0x20d   :  { %v112_v23 = vadd.f32 1e-05, %v110_v22 }
 0x20f   :  { %168 = vrsqrt.f32 %v112_v23 }
 0x219   :  { %v169_v25 = vpop.eup %168 }
 0x21a   :  { %v114_v26 = vmul.f32 %v169_v25, %v111_v24 }
 0x21c   :  { %117 = vperm.xlu1 %162, %v114_v26  }
 0x220   :  { %124 = vperm.xlu1 %162, %v121_v27  }
 0x29b   :  { %v118_v28 = vpop.permute.xlu1 %117 }
 0x29c   :  { %v120_v29 = vmul.f32 %v118_v28, %v105_v17 }
 0x29f   :  { %v125_v30 = vpop.permute.xlu1 %124 }
 0x2a0   :  { %v127_v31 = vadd.f32 %v125_v30, %v120_v29 }
 0x2a2   :  { %vm128_vm4 = vcmp.ge.f32.partialorder %v127_v31, 0.0  ;;  %v129_v32 = vmul.f32 0.1, %v127_v31 }
 0x2a4   :  { %v130_v33 = vsel %vm128_vm4, %v127_v31, %v129_v32 }
 0x2a5   :  { %v131_v34 = vpack.c.bf16 %v130_v33, %v130_v33 }
 0x2a7   :  { %132 = vst [vmem:[%s226_s4] sm:$0x3] %v131_v34 }

// kernel: unet_forward.14
= control target key start
LH: loop header
LB: loop body
LE: loop exit
PB: predicated region body
PF: predicated region fallthrough
CT: control target
= control target key end

     0   :  { %v159_v0 = vmov 0.0   ;;  %vm160_vm0 = vmmov 0   ;;  %v161_v2 = vmov 0   ;;  %vm58_vm1 = vcmask 1041408   ;;  %s203_s1 = inlined_call_operand.vmem [shape: bf16[36,128], index: 1, kind: input, shape index: {}]   ;;  %s204_s2 = inlined_call_operand.vmem [shape: f32[16,1], index: 2, kind: input, shape index: {}]   ;;  %s205_s0 = inlined_call_operand.vmem [shape: bf16[16,36], index: 0, kind: input, shape index: {}]   ;;  %s206_s3 = inlined_call_operand.vmem [shape: bf16[16,128], index: 3, kind: output, shape index: {}]  }
   0x1   :  { %141 = vmatprep.subr.bf16.mxu0 %v159_v0  ;;  %v155_v1 = vld [vmem:[%s203_s1] sm:$0xff]   ;;  %147 = vmatprep.mubr.msk.bf16.mxu0 %vm160_vm0, %v159_v0  ;;  %v156_v3 = vld [vmem:[%s203_s1 + $0x8] sm:$0xff]   ;;  %v157_v4 = vld [vmem:[%s203_s1 + $0x10] ss:$0 sps:$4 sm:$0x33]   ;;  %vm54_vm2 = vcmask 293888  }
   0x2   :  { %154 = vset.pattern.permute.xlu0 %v161_v2  ;;  %142 = vmatpush3.bf16.msra.mxu0 %v155_v1  ;;  %v22_v5 = vld [vmem:[%s204_s2] sm:$0xff]  ;;  %v23_v6 = vld [vmem:[%s204_s2 + $0x8] sm:$0xff]  ;;  %v60_v7 = vsel %vm58_vm1, %v157_v4, 0 }
   0x3   :  { %143 = vmatprep.subr.bf16.mxu0 %v159_v0  ;;  %26 = vperm.xlu0 %154, %v22_v5   ;;  %v158_v8 = vld [vmem:[%s205_s0] sm:$0xff]  }
   0x6   :  { %144 = vmatpush3.bf16.msra.mxu0 %v156_v3 }
   0x7   :  { %145 = vmatprep.subr.bf16.mxu0 %v159_v0  ;;  %31 = vperm.xlu0 %154, %v23_v6  }
   0xa   :  { %146 = vmatpush3.bf16.msra.mxu0 %v60_v7 }
   0xd   :  { %148 = vmatmul.mubr.msk.bf16.vlgmr.msra.gmra.mrb[0].mxu0 %vm54_vm2, %v158_v8 }
  0x82   :  { %v27_v9 = vpop.permute.xlu0 %26 }
  0x86   :  { %v32_v13 = vpop.permute.xlu0 %31 }
  0xe0   :  { %v96_v10 = vpop.f32.mrb[0].mxu0 }
  0xe1   :  { %v97_v11 = vadd.f32 %v96_v10, %v27_v9  ;;  %v149_v12 = vpop.f32.mrb[1].mxu0 }
  0xe2   :  { %v99_v14 = vpop.f32.mrb[2].mxu0 }
  0xe3   :  { %v105_v15 = vmul.f32 0.1, %v97_v11  ;;  %v100_v16 = vadd.f32 %v99_v14, %v32_v13  ;;  %v150_v17 = vpop.f32.mrb[3].mxu0  ;;  %vm103_vm3 = vcmp.ge.f32.partialorder %v97_v11, 0.0 }
  0xe5   :  { %vm104_vm4 = vcmp.ge.f32.partialorder %v100_v16, 0.0  ;;  %v106_v18 = vmul.f32 0.1, %v100_v16  ;;  %v107_v19 = vsel %vm103_vm3, %v97_v11, %v105_v15 }
  0xe7   :  { %v108_v20 = vsel %vm104_vm4, %v100_v16, %v106_v18 }
  0xe8   :  { %v135_v21 = vpack.c.bf16 %v108_v20, %v107_v19 }
  0xea   :  { %136 = vst [vmem:[%s206_s3] sm:$0xff] %v135_v21  }

// kernel: unet_forward.13
= control target key start
LH: loop header
LB: loop body
LE: loop exit
PB: predicated region body
PF: predicated region fallthrough
CT: control target
= control target key end

     0   :  { %v157_v0 = vmov 0.0   ;;  %vm158_vm0 = vmmov 0   ;;  %vm43_vm1 = vcmask 1041408   ;;  %vm39_vm2 = vcmask 293888   ;;  %s206_s1 = inlined_call_operand.vmem [shape: bf16[36,128], index: 1, kind: input, shape index: {}]   ;;  %s207_s0 = inlined_call_operand.vmem [shape: bf16[4,36], index: 0, kind: input, shape index: {}]   ;;  %s208_s2 = inlined_call_operand.vmem [shape: f32[4,1], index: 2, kind: input, shape index: {}]   ;;  %s209_s3 = inlined_call_operand.vmem [shape: f32[4,1], index: 3, kind: input, shape index: {}]   ;;  %s210_s4 = inlined_call_operand.vmem [shape: bf16[4,128], index: 4, kind: output, shape index: {}]  }
   0x1   :  { %137 = vmatprep.subr.bf16.mxu0 %v157_v0  ;;  %v152_v1 = vld [vmem:[%s206_s1] sm:$0xff]   ;;  %143 = vmatprep.mubr.msk.bf16.mxu0 %vm158_vm0, %v157_v0  ;;  %v153_v2 = vld [vmem:[%s206_s1 + $0x8] sm:$0xff]   ;;  %v154_v3 = vld [vmem:[%s206_s1 + $0x10] ss:$0 sps:$4 sm:$0x33]   ;;  %v87_v6 = vlaneseq  ;;  %vm91_vm4 = vcmask 1043456  }
   0x2   :  { %138 = vmatpush3.bf16.msra.mxu0 %v152_v1  ;;  %v45_v4 = vsel %vm43_vm1, %v154_v3, 0  ;;  %v18_v5 = vld [vmem:[%s207_s0] sm:$0x3]  ;;  %v159_v20 = vmov 0  }
   0x3   :  { %139 = vmatprep.subr.bf16.mxu0 %v157_v0  ;;  %v88_v7 = vand.u32 127, %v87_v6  ;;  %150 = vset.pattern.permute.xlu1 %v159_v20  ;;  %v103_v24 = vld [vmem:[%s208_s2] sm:$0xf] }
   0x4   :  { %151 = vset.pattern.permute.xlu0 %v159_v20  ;;  %v113_v27 = vld [vmem:[%s209_s3] sm:$0xf] }
   0x5   :  { %vm89_vm3 = vcmp.lt.s32.totalorder %v88_v7, 8 }
   0x6   :  { %140 = vmatpush3.bf16.msra.mxu0 %v153_v2 }
   0x7   :  { %141 = vmatprep.subr.bf16.mxu0 %v157_v0 }
   0xa   :  { %142 = vmatpush3.bf16.msra.mxu0 %v45_v4 }
   0xd   :  { %144 = vmatmul.mubr.msk.bf16.vlgmr.msra.gmra.mrb[0].mxu0 %vm39_vm2, %v18_v5 }
  0xe0   :  { %v81_v8 = vpop.f32.mrb[0].mxu0 }
  0xe1   :  { %v145_v9 = vpop.f32.mrb[1].mxu0  ;;  %v90_v10 = vsel %vm89_vm3, %v81_v8, 0.0 }
  0xe2   :  { %v84_v11 = vpop.f32.mrb[2].mxu0  ;;  %v92_v12 = vsel %vm91_vm4, %v90_v10, 0.0 }
  0xe3   :  { %93 = vadd.xlane.f32.xlu0 %v92_v12  ;;  %v146_v13 = vpop.f32.mrb[3].mxu0 }
 0x170   :  { %v94_v14 = vpop.xlane.xlu0 %93 }
 0x171   :  { %v95_v15 = vmul.f32 0.125, %v94_v14 }
 0x173   :  { %v96_v16 = vsub.f32 %v81_v8, %v95_v15 }
 0x175   :  { %v97_v17 = vsel %vm89_vm3, %v96_v16, 0.0 }
 0x176   :  { %v98_v18 = vmul.f32 %v97_v17, %v97_v17 }
 0x178   :  { %v99_v19 = vsel %vm91_vm4, %v98_v18, 0.0 }
 0x179   :  { %100 = vadd.xlane.f32.xlu0 %v99_v19 }
 0x206   :  { %v101_v21 = vpop.xlane.xlu0 %100 }
 0x207   :  { %v102_v22 = vmul.f32 0.125, %v101_v21 }
 0x209   :  { %v104_v23 = vadd.f32 1e-05, %v102_v22 }
 0x20b   :  { %155 = vrsqrt.f32 %v104_v23 }
 0x215   :  { %v156_v25 = vpop.eup %155 }
 0x216   :  { %v106_v26 = vmul.f32 %v156_v25, %v103_v24 }
 0x218   :  { %109 = vperm.xlu1 %150, %v106_v26  }
 0x21c   :  { %116 = vperm.xlu1 %150, %v113_v27  }
 0x297   :  { %v110_v28 = vpop.permute.xlu1 %109 }
 0x298   :  { %v112_v29 = vmul.f32 %v110_v28, %v97_v17 }
 0x29b   :  { %v117_v30 = vpop.permute.xlu1 %116 }
 0x29c   :  { %v119_v31 = vadd.f32 %v117_v30, %v112_v29 }
 0x29e   :  { %vm120_vm5 = vcmp.ge.f32.partialorder %v119_v31, 0.0  ;;  %v121_v32 = vmul.f32 0.1, %v119_v31 }
 0x2a0   :  { %v122_v33 = vsel %vm120_vm5, %v119_v31, %v121_v32 }
 0x2a1   :  { %v123_v34 = vpack.c.bf16 %v122_v33, %v122_v33 }
 0x2a3   :  { %124 = vst [vmem:[%s210_s4] sm:$0x3] %v123_v34 }

// kernel: unet_forward.15
= control target key start
LH: loop header
LB: loop body
LE: loop exit
PB: predicated region body
PF: predicated region fallthrough
CT: control target
= control target key end

     0   :  { %v185_v0 = vmov 0.0   ;;  %vm186_vm0 = vmmov 0   ;;  %v187_v2 = vmov 0   ;;  %vm74_vm1 = vcmask 1043456   ;;  %s235_s1 = inlined_call_operand.vmem [shape: bf16[72,128], index: 1, kind: input, shape index: {}]   ;;  %s236_s2 = inlined_call_operand.vmem [shape: f32[16,1], index: 2, kind: input, shape index: {}]   ;;  %s237_s0 = inlined_call_operand.vmem [shape: bf16[16,72], index: 0, kind: input, shape index: {}]   ;;  %s238_s3 = inlined_call_operand.vmem [shape: bf16[16,128], index: 3, kind: output, shape index: {}]  }
   0x1   :  { %161 = vmatprep.subr.bf16.mxu0 %v185_v0  ;;  %v179_v1 = vld [vmem:[%s235_s1] sm:$0xff]   ;;  %171 = vmatprep.mubr.msk.bf16.mxu0 %vm186_vm0, %v185_v0  ;;  %v180_v3 = vld [vmem:[%s235_s1 + $0x8] sm:$0xff]   ;;  %v181_v5 = vld [vmem:[%s235_s1 + $0x10] sm:$0xff]   ;;  %vm70_vm2 = vcmask 588800  }
   0x2   :  { %178 = vset.pattern.permute.xlu0 %v187_v2  ;;  %162 = vmatpush3.bf16.msra.mxu0 %v179_v1  ;;  %v26_v4 = vld [vmem:[%s236_s2] sm:$0xff]  ;;  %v27_v6 = vld [vmem:[%s236_s2 + $0x8] sm:$0xff]  ;;  %v182_v7 = vld [vmem:[%s235_s1 + $0x18] sm:$0xff]  }
   0x3   :  { %163 = vmatprep.subr.bf16.mxu0 %v185_v0  ;;  %30 = vperm.xlu0 %178, %v26_v4   ;;  %v183_v8 = vld [vmem:[%s235_s1 + $0x20] ss:$0 sps:$4 sm:$0xff]  }
   0x4   :  { %v76_v9 = vsel %vm74_vm1, %v183_v8, 0  ;;  %v184_v10 = vld [vmem:[%s237_s0] sm:$0xff]  }
   0x6   :  { %164 = vmatpush3.bf16.msra.mxu0 %v180_v3 }
   0x7   :  { %165 = vmatprep.subr.bf16.mxu0 %v185_v0  ;;  %35 = vperm.xlu0 %178, %v27_v6  }
   0xa   :  { %166 = vmatpush3.bf16.msra.mxu0 %v181_v5 }
   0xb   :  { %167 = vmatprep.subr.bf16.mxu0 %v185_v0 }
   0xe   :  { %168 = vmatpush3.bf16.msra.mxu0 %v182_v7 }
   0xf   :  { %169 = vmatprep.subr.bf16.mxu0 %v185_v0 }
  0x12   :  { %170 = vmatpush3.bf16.msra.mxu0 %v76_v9 }
  0x15   :  { %172 = vmatmul.mubr.msk.bf16.vlgmr.msra.gmra.mrb[0].mxu0 %vm70_vm2, %v184_v10 }
  0x82   :  { %v31_v11 = vpop.permute.xlu0 %30 }
  0x86   :  { %v36_v15 = vpop.permute.xlu0 %35 }
  0xe8   :  { %v112_v12 = vpop.f32.mrb[0].mxu0 }
  0xe9   :  { %v113_v13 = vadd.f32 %v112_v12, %v31_v11  ;;  %v173_v14 = vpop.f32.mrb[1].mxu0 }
  0xea   :  { %v115_v16 = vpop.f32.mrb[2].mxu0 }
  0xeb   :  { %v121_v17 = vmul.f32 0.1, %v113_v13  ;;  %v116_v18 = vadd.f32 %v115_v16, %v36_v15  ;;  %v174_v19 = vpop.f32.mrb[3].mxu0  ;;  %vm119_vm3 = vcmp.ge.f32.partialorder %v113_v13, 0.0 }
  0xed   :  { %vm120_vm4 = vcmp.ge.f32.partialorder %v116_v18, 0.0  ;;  %v122_v20 = vmul.f32 0.1, %v116_v18  ;;  %v123_v21 = vsel %vm119_vm3, %v113_v13, %v121_v17 }
  0xef   :  { %v124_v22 = vsel %vm120_vm4, %v116_v18, %v122_v20 }
  0xf0   :  { %v153_v23 = vpack.c.bf16 %v124_v22, %v123_v21 }
  0xf2   :  { %154 = vst [vmem:[%s238_s3] sm:$0xff] %v153_v23  }

// kernel: unet_forward.17
= control target key start
LH: loop header
LB: loop body
LE: loop exit
PB: predicated region body
PF: predicated region fallthrough
CT: control target
= control target key end

     0   :  { %s532_s12 = smov 0   ;;  %s534_s13 = smov 0   ;;  %s590_s0 = inlined_call_operand.vmem [shape: bf16[4,72], index: 0, kind: input, shape index: {}]   ;;  %s591_s1 = inlined_call_operand.vmem [shape: bf16[72,512], index: 1, kind: input, shape index: {}]   ;;  %s592_s2 = inlined_call_operand.vmem [shape: f32[4,1], index: 2, kind: input, shape index: {}]   ;;  %s593_s3 = inlined_call_operand.vmem [shape: f32[4,512], index: 3, kind: output, shape index: {}]  }
   0x1   :  { %s536_s14 = smov 0  }
   0x2 LB: > { %s421_s15 = sadd.s32 4294967295, %s509_s14   ;;  %s549_s16 = sadd.s32 1, %s509_s14   ;;  %s509_s14 = sphi %s536_s14, %s596_s14   ;;  %s505_s13 = sphi %s534_s13, %s595_s13   ;;  %s501_s12 = sphi %s532_s12, %s594_s12  }
   0x3   : > { %s38_s17 = ssub.s32 %s509_s14, %s549_s16  ;;  %s41_s18 = sadd.s32 1, %s505_s13 }
   0x4   : > { %p39_p0 = scmp.eq.s32.totalorder %s38_s17, 0  ;;  %p48_p1 = scmp.ne.s32.totalorder %s505_s13, %s501_s12 }
   0x5   : > { %p49_p2 = scmp.eq.s32.totalorder %s509_s14, 0  ;;  %p424_p4 = scmp.ge.s32.totalorder %s509_s14, 2 }
   0x6   : > { %s558_s19 = scalar_select %p39_p0, %s505_s13, %s41_s18  }
   0x7   : > { %p50_p3 = por %p49_p2, %p48_p1  ;;  %127 = sbr.rel (%p424_p4) target bundleno = 23 (0x17), region = 24 }
   0xe   : > { %130 = sbr.rel (!%p50_p3) target bundleno = 23 (0x17), region = 28  ;;  %s132_s20 = sand.u32 (%p50_p3), 1, %s505_s13  }
   0xf   : > { %s444_s21 = sshll.u32 (%p50_p3), %s509_s14, 3  ;;  %s445_s22 = smul.u32 (%p50_p3), 72, %s132_s20 }
  0x10   : > { %s137_s25 = scalar_lea.vmem (%p50_p3), %s591_s1, %s444_s21 }
  0x11   : > { %v181_v0 = vld [vmem:[%s137_s25] sm:$0xff] (%p50_p3)  ;;  %v183_v1 = vld [vmem:[%s137_s25 + $0x10] sm:$0xff] (%p50_p3)  ;;  %s134_s26 = scalar_lea.vmem (%p50_p3), [#allocation2], %s445_s22 }
  0x12   : > { %v185_v2 = vld [vmem:[%s137_s25 + $0x20] sm:$0xff] (%p50_p3)  ;;  %v187_v3 = vld [vmem:[%s137_s25 + $0x30] sm:$0xff] (%p50_p3)  ;;  %182 = vst [vmem:[%s134_s26] sm:$0xff] (%p50_p3), %v181_v0  ;;  %184 = vst [vmem:[%s134_s26 + $0x8] sm:$0xff] (%p50_p3), %v183_v1 }
  0x13   : > { %v189_v4 = vld [vmem:[%s137_s25 + $0x40] sm:$0xff] (%p50_p3)  ;;  %v191_v5 = vld [vmem:[%s137_s25 + $0x50] sm:$0xff] (%p50_p3)  ;;  %186 = vst [vmem:[%s134_s26 + $0x10] sm:$0xff] (%p50_p3), %v185_v2  ;;  %188 = vst [vmem:[%s134_s26 + $0x18] sm:$0xff] (%p50_p3), %v187_v3 }
  0x14   : > { %190 = vst [vmem:[%s134_s26 + $0x20] sm:$0xff] (%p50_p3), %v189_v4  ;;  %192 = vst [vmem:[%s134_s26 + $0x28] sm:$0xff] (%p50_p3), %v191_v5  ;;  %v193_v6 = vld [vmem:[%s137_s25 + $0x60] sm:$0xff] (%p50_p3)  ;;  %v195_v7 = vld [vmem:[%s137_s25 + $0x70] sm:$0xff] (%p50_p3) }
  0x15   : > { %v197_v8 = vld [vmem:[%s137_s25 + $0x80] sm:$0xff]  ;;  %194 = vst [vmem:[%s134_s26 + $0x30] sm:$0xff] %v193_v6  ;;  %196 = vst [vmem:[%s134_s26 + $0x38] sm:$0xff] %v195_v7 }
  0x16   : > { %198 = vst [vmem:[%s134_s26 + $0x40] sm:$0xff] %v197_v8 }
  0x17 PF: > { %p427_p5 = scmp.ge.s32.totalorder %s509_s14, 1  ;;  %p203_p6 = scmp.lt.s32.totalorder %s509_s14, 3 }
  0x19   : > { %p204_p7 = pnand %p427_p5, %p203_p6 }
  0x1a   : > { %s210_s27 = sand.u32 (!%p204_p7), 1, %s501_s12   ;;  %v511_v9 = vmov (!%p204_p7), 0   ;;  %v251_v10 = vld [vmem:[%s592_s2] sm:$0xf] (!%p204_p7)  ;;  %vm306_vm0 = vcmask (!%p204_p7), 1043456   ;;  %vm302_vm1 = vcmask (!%p204_p7), 588800  }
  0x1b   : > { %207 = sbr.rel (%p204_p7) target bundleno = 270 (0x10e), region = 66  ;;  %345 = vmatprep.mubr.bf16.mxu0 (!%p204_p7), %v511_v9  ;;  %472 = vset.pattern.permute.xlu0 (!%p204_p7), %v511_v9  ;;  %v241_v23 = vld [vmem:[%s590_s0] sm:$0x3] (!%p204_p7)  ;;  %s428_s7 = sshll.u32 (!%p204_p7), %s421_s15, 1 }
  0x1c   : > { %s446_s28 = smul.u32 (!%p204_p7), 72, %s210_s27  ;;  %254 = vperm.xlu0 (!%p204_p7), %472, %v251_v10   ;;  %p235_p8 = scmp.lt.s32.totalorder (!%p204_p7), %s428_s7, 3 }
  0x1e   : > { %s212_s4 = scalar_lea.vmem (!%p204_p7), [#allocation2], %s446_s28 }
  0x1f   : > { %v473_v11 = vld [vmem:[%s212_s4 + $0x4] ss:$8 sps:$4 sm:$0xff] (!%p204_p7)   ;;  %v475_v12 = vld [vmem:[%s212_s4] ss:$8 sps:$4 sm:$0xff] (!%p204_p7)   ;;  %v476_v13 = vld [vmem:[%s212_s4 + $0x14] ss:$8 sps:$4 sm:$0xff] (!%p204_p7)  }
  0x20   : > { %313 = vmatprep.subr.bf16.mxu0 (!%p204_p7), %v473_v11  ;;  %v478_v14 = vld [vmem:[%s212_s4 + $0x10] ss:$8 sps:$4 sm:$0xff] (!%p204_p7)   ;;  %v479_v15 = vld [vmem:[%s212_s4 + $0x24] ss:$8 sps:$4 sm:$0xff] (!%p204_p7)   ;;  %v481_v16 = vld [vmem:[%s212_s4 + $0x20] ss:$8 sps:$4 sm:$0xff] (!%p204_p7)  }
  0x21   : > { %314 = vmatpush1.bf16.msra.mxu0 (!%p204_p7), %v475_v12  ;;  %v482_v17 = vld [vmem:[%s212_s4 + $0x34] ss:$8 sps:$4 sm:$0xff] (!%p204_p7)   ;;  %v250_v18 = vld [vmem:[%s212_s4 + $0x40] sm:$0xff] (!%p204_p7)  ;;  %v484_v19 = vld [vmem:[%s212_s4 + $0x30] ss:$8 sps:$4 sm:$0xff] (!%p204_p7)  }
  0x22   : > { %315 = vmatprep.subr.bf16.mxu0 %v476_v13  ;;  %v439_v20 = vcombine.high %v250_v18, %v250_v18  ;;  %v438_v21 = vcombine.low %v250_v18, %v250_v18  ;;  %s598_s7 = smov (!%p235_p8, %s428_s7), 3 }
  0x23   : > { %s429_s8 = sshll.u32 %s598_s7, 2 }
  0x24   : > { %v308_v22 = vsel %vm306_vm0, %v438_v21, 0  ;;  %s238_s11 = scalar_lea.vmem %s593_s3, %s429_s8 }
  0x25   : > { %316 = vmatpush1.bf16.msra.mxu0 %v478_v14 }
  0x26   : > { %317 = vmatprep.subr.bf16.mxu0 %v479_v15 }
  0x29   : > { %318 = vmatpush1.bf16.msra.mxu0 %v481_v16 }
  0x2a   : > { %319 = vmatprep.subr.bf16.mxu0 %v482_v17 }
  0x2d   : > { %320 = vmatpush1.bf16.msra.mxu0 %v484_v19 }
  0x2e   : > { %440 = vmatprep.subr.msk.bf16.mxu0 %vm306_vm0, %v439_v20 }
  0x31   : > { %322 = vmatpush1.bf16.msra.mxu0 %v308_v22 }
  0x34   : > { %441 = vmatmul.mubr.msk.bf16.vlgmr.msra.gmra.mrb[0].mxu0 %vm302_vm1, %v241_v23 }
  0x9b   : > { %v255_v24 = vpop.permute.xlu0 %254 }
 0x107   : > { %v347_v25 = vpop.f32.mrb[0].mxu0 }
 0x108   : > { %v348_v26 = vadd.f32 %v347_v25, %v255_v24  ;;  %v349_v27 = vpop.f32.mrb[1].mxu0 }
 0x109   : > { %v350_v28 = vadd.f32 %v349_v27, %v255_v24  ;;  %v351_v29 = vpop.f32.mrb[2].mxu0 }
 0x10a   : > { %v352_v30 = vpop.f32.mrb[3].mxu0 }
 0x10b   : > { %v356_v31 = vcombine.low %v348_v26, %v350_v28 }
 0x10d   : > { %358 = vst [vmem:[%s238_s11] sm:$0xff] %v356_v31 }
 0x10e PF: > { %p10_p9 = scmp.ge.s32.totalorder %s549_s16, 4   ;;  %s594_s12 = smov %s505_s13 }
 0x10f   : > { %s595_s13 = smov %s558_s19  ;;  %s596_s14 = smov %s549_s16 }
 0x110   :  { %12 = sbr.rel (!%p10_p9) target bundleno = 2 (0x2), region = 105 }

</bundles_post_ra>
